<compile_context>
chip_gen: v6e
topology: v6e:2x2x1
jax: 0.10.0
libtpu: 0.0.40
codegen_flags: <defaults>
</compile_context>

<pallas_src>
import numpy as np
import jax
import jax.numpy as jnp
from jax import lax
from jax.experimental import pallas as pl
from jax.experimental.pallas import tpu as pltpu


def _round_up(x, m):
    return (x + m - 1) // m * m


# ---------------------------------------------------------------------------
# Pallas kernel: bidirectional LSTM, emit output at the last time index only.
# ---------------------------------------------------------------------------
def bilstm_last_kernel(x_ref, wih_f_ref, whh_f_ref, b_f_ref,
                       wih_b_ref, b_b_ref, out_ref, p_ref):
    """
    x_ref   : (T, BNT, F)     time-major activations for this BN tile
    wih_f   : (F,  4*Hp)      forward input->gate weights, gates [i,f,g,o]
    whh_f   : (Hp, 4*Hp)      forward hidden->gate weights
    b_f     : (1,  4*Hp)      forward combined bias (b_ih + b_hh)
    wih_b   : (F,  3*Hp)      backward input->gate weights, gates [i,g,o] only
    b_b     : (1,  3*Hp)      backward combined bias, gates [i,g,o] only
    out_ref : (BNT, 2*Hp)     [ forward final hidden | backward hidden @ t=T-1 ]
    p_ref   : (T, BNT, 4*Hp)  VMEM scratch: hoisted forward input projection
    """
    T, BNT, _ = x_ref.shape
    Hp = whh_f_ref.shape[0]

    # ---- h-independent MXU work first: T input projections (bias folded in),
    #      unrolled so the matmuls pipeline back-to-back through the MXU. ------
    wih_f = wih_f_ref[...]
    b_f = b_f_ref[...]

    @pl.loop(0, T, unroll=True)
    def _(t):
        p_ref[t] = (jnp.dot(x_ref[t], wih_f,
                            preferred_element_type=jnp.float32) + b_f)

    # ---- backward-direction output at t=T-1 == its first step (zero state);
    #      h0 @ Whh_b and f*c0 are exactly zero, so only gates i, g, o exist. --
    pb = (jnp.dot(x_ref[T - 1], wih_b_ref[...],
                  preferred_element_type=jnp.float32) + b_b_ref[...])
    i_b = jax.nn.sigmoid(pb[:, 0 * Hp:1 * Hp])
    g_b = jnp.tanh(pb[:, 1 * Hp:2 * Hp])
    o_b = jax.nn.sigmoid(pb[:, 2 * Hp:3 * Hp])
    out_ref[:, Hp:2 * Hp] = (o_b * jnp.tanh(i_b * g_b)).astype(out_ref.dtype)

    # ---- serial forward recurrence: one fused (BNT,Hp)@(Hp,4Hp) dot per step -
    h0 = jnp.zeros((BNT, Hp), jnp.float32)
    c0 = jnp.zeros((BNT, Hp), jnp.float32)

    def step(t, carry):
        h, c = carry
        gates = p_ref[t] + jnp.dot(h, whh_f_ref[...],
                                   preferred_element_type=jnp.float32)
        i = jax.nn.sigmoid(gates[:, 0 * Hp:1 * Hp])
        f = jax.nn.sigmoid(gates[:, 1 * Hp:2 * Hp])
        g = jnp.tanh(gates[:, 2 * Hp:3 * Hp])
        o = jax.nn.sigmoid(gates[:, 3 * Hp:4 * Hp])
        c_new = f * c + i * g
        h_new = o * jnp.tanh(c_new)
        return h_new, c_new

    h_fwd, _ = lax.fori_loop(0, T, step, (h0, c0), unroll=True)

    # lane-aligned (Hp multiple of 128) unmasked store of the forward half
    out_ref[:, 0:Hp] = h_fwd.astype(out_ref.dtype)


# ---------------------------------------------------------------------------
# Parameter init (deterministic, PyTorch nn.LSTM layout: (4H, F)/(4H, H)/(4H,))
# ---------------------------------------------------------------------------
def init_feature_encoder_params(key, in_features, hidden_features):
    H = hidden_features // 2
    bound = 1.0 / np.sqrt(H)
    keys = jax.random.split(key, 8)

    def u(k_, shape):
        return jax.random.uniform(k_, shape, jnp.float32, -bound, bound)

    params = {}
    for d, tag in enumerate(("f", "b")):   # forward / reverse direction
        wih = u(keys[4 * d + 0], (4 * H, in_features))
        whh = u(keys[4 * d + 1], (4 * H, H))
        bih = u(keys[4 * d + 2], (4 * H,))
        bhh = u(keys[4 * d + 3], (4 * H,))
        params[f"wih_{tag}"] = wih
        params[f"whh_{tag}"] = whh
        params[f"b_{tag}"] = bih + bhh     # combined bias (exact: b_ih + b_hh)
    return params


# ---------------------------------------------------------------------------
# Weight repacking: PyTorch (4H, D) -> lane-dense (D, G*Hp), gate-blocked,
# hidden dim zero-padded to Hp (a multiple of 128). Zero padding is exact:
# padded gate pre-activations are 0 so padded h/c lanes stay identically 0.
# ---------------------------------------------------------------------------
def _pack_ih(wih, H, Hp):
    D = wih.shape[1]
    w = jnp.pad(wih.reshape(4, H, D), ((0, 0), (0, Hp - H), (0, 0)))
    return jnp.transpose(w, (2, 0, 1)).reshape(D, 4 * Hp).astype(jnp.float32)


def _pack_hh(whh, H, Hp):
    w = jnp.pad(whh.reshape(4, H, H), ((0, 0), (0, Hp - H), (0, Hp - H)))
    return jnp.transpose(w, (2, 0, 1)).reshape(Hp, 4 * Hp).astype(jnp.float32)


def _pack_bias(b, H, Hp):
    return (jnp.pad(b.reshape(4, H), ((0, 0), (0, Hp - H)))
            .reshape(1, 4 * Hp).astype(jnp.float32))


def _pack_ih_igo(wih, H, Hp):
    """Backward direction: keep only gates [i, g, o] (f-gate * c0 == 0)."""
    D = wih.shape[1]
    w = wih.reshape(4, H, D)[jnp.array([0, 2, 3])]          # (3, H, D)
    w = jnp.pad(w, ((0, 0), (0, Hp - H), (0, 0)))
    return jnp.transpose(w, (2, 0, 1)).reshape(D, 3 * Hp).astype(jnp.float32)


def _pack_bias_igo(b, H, Hp):
    b3 = b.reshape(4, H)[jnp.array([0, 2, 3])]              # (3, H)
    return (jnp.pad(b3, ((0, 0), (0, Hp - H)))
            .reshape(1, 3 * Hp).astype(jnp.float32))


# ---------------------------------------------------------------------------
# Wrapper (glue: reshape / transpose / padding / weight repacking in plain JAX)
# ---------------------------------------------------------------------------
def feature_encoder_forward(X, params, hidden_features, *, bn_tile=256):
    # TODO(synk): mask / pack_padded_sequence path (variable-length walks) not implemented.
    batch, n_walk, T, F = X.shape
    H = hidden_features // 2
    Hp = _round_up(H, 128)          # hidden lanes padded to full vregs
    G4 = 4 * Hp                     # fused forward gate width (mult of 128)
    G3 = 3 * Hp                     # backward [i,g,o] gate width (mult of 128)
    BN = batch * n_walk
    BN_TILE = min(bn_tile, _round_up(BN, 8))
    BN_pad = _round_up(BN, BN_TILE)

    # time-major activations (T, BN_pad, F), f32
    x = jnp.transpose(X.reshape(BN, T, F), (1, 0, 2)).astype(jnp.float32)
    if BN_pad != BN:
        x = jnp.pad(x, ((0, 0), (0, BN_pad - BN), (0, 0)))

    wih_f = _pack_ih(params["wih_f"], H, Hp)
    whh_f = _pack_hh(params["whh_f"], H, Hp)
    b_f = _pack_bias(params["b_f"], H, Hp)
    wih_b = _pack_ih_igo(params["wih_b"], H, Hp)
    b_b = _pack_bias_igo(params["b_b"], H, Hp)

    grid = (BN_pad // BN_TILE,)

    # VMEM budget from the actual tile footprint (double-buffered activation /
    # output specs + weights + projection scratch), clamped to a range that is
    # safe on v5e / v6e / v7x scoped-VMEM limits.
    F_lane = _round_up(F, 128)
    F_sub = _round_up(F, 8)
    vmem_bytes = 4 * (2 * T * BN_TILE * F_lane          # x tile (dbl-buffered)
                      + T * BN_TILE * G4                # projection scratch
                      + F_sub * G4 + Hp * G4 + 8 * G4   # fwd weights + bias
                      + F_sub * G3 + 8 * G3             # bwd weights + bias
                      + 2 * BN_TILE * 2 * Hp)           # out tile (dbl-buffered)
    vmem_limit = int(min(48 * 1024 * 1024, max(2 * vmem_bytes, 16 * 1024 * 1024)))

    out = pl.pallas_call(
        bilstm_last_kernel,
        out_shape=jax.ShapeDtypeStruct((BN_pad, 2 * Hp), jnp.float32),
        grid_spec=pltpu.PrefetchScalarGridSpec(
            num_scalar_prefetch=0,
            grid=grid,
            in_specs=[
                pl.BlockSpec((T, BN_TILE, F), lambda i: (0, i, 0)),   # x tile
                pl.BlockSpec((F, G4), lambda i: (0, 0)),              # wih_f
                pl.BlockSpec((Hp, G4), lambda i: (0, 0)),             # whh_f
                pl.BlockSpec((1, G4), lambda i: (0, 0)),              # b_f
                pl.BlockSpec((F, G3), lambda i: (0, 0)),              # wih_b (i,g,o)
                pl.BlockSpec((1, G3), lambda i: (0, 0)),              # b_b   (i,g,o)
            ],
            out_specs=pl.BlockSpec((BN_TILE, 2 * Hp), lambda i: (i, 0)),
            scratch_shapes=[pltpu.VMEM((T, BN_TILE, G4), jnp.float32)],
        ),
        compiler_params=pltpu.CompilerParams(
            dimension_semantics=("parallel",),   # shard BN tiles across TCs (v7x)
            vmem_limit_bytes=vmem_limit,
        ),
    )(x, wih_f, whh_f, b_f, wih_b, b_b)

    out = out[:BN]
    # un-pad: forward hidden = lanes [0:H], backward hidden = lanes [Hp:Hp+H]
    enc = jnp.concatenate([out[:, :H], out[:, Hp:Hp + H]], axis=-1)
    # nn.Dropout(p) is identity in eval mode.
    return enc.reshape(batch, n_walk, 2 * H)


# ---------------------------------------------------------------------------
# Pure-JAX reference (for correctness check only)
# ---------------------------------------------------------------------------
def feature_encoder_reference(X, params, hidden_features):
    batch, n_walk, T, F = X.shape
    H = hidden_features // 2
    x = X.reshape(batch * n_walk, T, F).astype(jnp.float32)

    def run_dir(tag, x_seq):
        wih, whh, b = params[f"wih_{tag}"], params[f"whh_{tag}"], params[f"b_{tag}"]

        def step(carry, x_t):
            h, c = carry
            gates = x_t @ wih.T + h @ whh.T + b
            i, f, g, o = jnp.split(gates, 4, axis=-1)
            c_new = jax.nn.sigmoid(f) * c + jax.nn.sigmoid(i) * jnp.tanh(g)
            h_new = jax.nn.sigmoid(o) * jnp.tanh(c_new)
            return (h_new, c_new), h_new

        h0 = jnp.zeros((x_seq.shape[0], H), jnp.float32)
        _, hs = lax.scan(step, (h0, h0), jnp.swapaxes(x_seq, 0, 1))
        return hs  # (T, BN, H)

    hs_f = run_dir("f", x)
    hs_b = run_dir("b", x[:, ::-1, :])
    out = jnp.concatenate([hs_f[-1], hs_b[0]], axis=-1)  # output at time index -1
    return out.reshape(batch, n_walk, 2 * H)


if __name__ == "__main__":
    batch, n_walk, len_walk, feat_dim = 2, 4, 8, 16
    hidden_features = 32  # -> H = 16 per direction, model_dim = 32

    key = jax.random.PRNGKey(0)
    k_x, k_p = jax.random.split(key)
    X = jax.random.normal(k_x, (batch, n_walk, len_walk, feat_dim), jnp.float32)
    params = init_feature_encoder_params(k_p, feat_dim, hidden_features)

    out = jax.block_until_ready(feature_encoder_forward(X, params, hidden_features))
    ref = jax.block_until_ready(feature_encoder_reference(X, params, hidden_features))

    assert out.shape == (batch, n_walk, hidden_features)
    np.testing.assert_allclose(np.asarray(out), np.asarray(ref), rtol=1e-4, atol=1e-5)

    print("KERNEL_OK")
</pallas_src>

<mosaic_0001>
module attributes {stable_mosaic.version = 11 : i64} {
  func.func @bilstm_last_kernel(%arg0: i32, %arg1: memref<8x8x16xf32, #tpu.memory_space<vmem>>, %arg2: memref<16x512xf32, #tpu.memory_space<vmem>>, %arg3: memref<128x512xf32, #tpu.memory_space<vmem>>, %arg4: memref<1x512xf32, #tpu.memory_space<vmem>>, %arg5: memref<16x384xf32, #tpu.memory_space<vmem>>, %arg6: memref<1x384xf32, #tpu.memory_space<vmem>>, %arg7: memref<8x256xf32, #tpu.memory_space<vmem>>, %arg8: memref<8x8x512xf32, #tpu.memory_space<vmem>>) attributes {dimension_semantics = [#tpu.dimension_semantics<parallel>], iteration_bounds = array<i64: 1>, scalar_prefetch = 0 : i64, scratch_operands = 1 : i64, tpu.core_type = #tpu.core_type<tc>, window_params = [{transform_indices = @transform_0, window_bounds = array<i64: 8, 8, 16>}, {pipeline_mode = #tpu.pipeline_mode<synchronous>, transform_indices = @transform_1, window_bounds = array<i64: 16, 512>}, {pipeline_mode = #tpu.pipeline_mode<synchronous>, transform_indices = @transform_2, window_bounds = array<i64: 128, 512>}, {pipeline_mode = #tpu.pipeline_mode<synchronous>, transform_indices = @transform_3, window_bounds = array<i64: 1, 512>}, {pipeline_mode = #tpu.pipeline_mode<synchronous>, transform_indices = @transform_4, window_bounds = array<i64: 16, 384>}, {pipeline_mode = #tpu.pipeline_mode<synchronous>, transform_indices = @transform_5, window_bounds = array<i64: 1, 384>}, {transform_indices = @transform_6, window_bounds = array<i64: 8, 256>}]} {
    %c0 = arith.constant 0 : index
    %c0_0 = arith.constant 0 : index
    %0 = vector.load %arg2[%c0, %c0_0] : memref<16x512xf32, #tpu.memory_space<vmem>>, vector<16x512xf32>
    %c0_1 = arith.constant 0 : index
    %c0_2 = arith.constant 0 : index
    %1 = vector.load %arg4[%c0_1, %c0_2] : memref<1x512xf32, #tpu.memory_space<vmem>>, vector<1x512xf32>
    %c0_i32 = arith.constant 0 : i32
    %c1_i32 = arith.constant 1 : i32
    %2 = arith.muli %c0_i32, %c1_i32 : i32
    %c0_i32_3 = arith.constant 0 : i32
    %3 = arith.addi %c0_i32_3, %2 : i32
    %4 = arith.index_cast %3 : i32 to index
    %c0_4 = arith.constant 0 : index
    %c0_5 = arith.constant 0 : index
    %5 = vector.load %arg1[%4, %c0_4, %c0_5] : memref<8x8x16xf32, #tpu.memory_space<vmem>>, vector<1x8x16xf32>
    %6 = vector.shape_cast %5 : vector<1x8x16xf32> to vector<8x16xf32>
    %cst = arith.constant dense<0.000000e+00> : vector<8x512xf32>
    %7 = tpu.matmul %6, %0, %cst {dimension_numbers = #tpu.dot_dimension_numbers<[1], [0], [0], [1], [0, 0, 1, 1], [], []>} : vector<8x16xf32>, vector<16x512xf32>, vector<8x512xf32> -> vector<8x512xf32>
    %8 = vector.broadcast %1 : vector<1x512xf32> to vector<8x512xf32>
    %9 = arith.addf %7, %8 : vector<8x512xf32>
    %10 = arith.index_cast %3 : i32 to index
    %c0_6 = arith.constant 0 : index
    %c0_7 = arith.constant 0 : index
    %11 = vector.load %arg8[%10, %c0_6, %c0_7] : memref<8x8x512xf32, #tpu.memory_space<vmem>>, vector<1x8x512xf32>
    %12 = vector.shape_cast %11 : vector<1x8x512xf32> to vector<8x512xf32>
    %13 = vector.shape_cast %9 : vector<8x512xf32> to vector<1x8x512xf32>
    tpu.vector_store %arg8[%10, %c0_6, %c0_7], %13 {strides = array<i32>} : memref<8x8x512xf32, #tpu.memory_space<vmem>>, vector<1x8x512xf32>,
    %c1_i32_8 = arith.constant 1 : i32
    %c1_i32_9 = arith.constant 1 : i32
    %14 = arith.muli %c1_i32_8, %c1_i32_9 : i32
    %c0_i32_10 = arith.constant 0 : i32
    %15 = arith.addi %c0_i32_10, %14 : i32
    %16 = arith.index_cast %15 : i32 to index
    %c0_11 = arith.constant 0 : index
    %c0_12 = arith.constant 0 : index
    %17 = vector.load %arg1[%16, %c0_11, %c0_12] : memref<8x8x16xf32, #tpu.memory_space<vmem>>, vector<1x8x16xf32>
    %18 = vector.shape_cast %17 : vector<1x8x16xf32> to vector<8x16xf32>
    %cst_13 = arith.constant dense<0.000000e+00> : vector<8x512xf32>
    %19 = tpu.matmul %18, %0, %cst_13 {dimension_numbers = #tpu.dot_dimension_numbers<[1], [0], [0], [1], [0, 0, 1, 1], [], []>} : vector<8x16xf32>, vector<16x512xf32>, vector<8x512xf32> -> vector<8x512xf32>
    %20 = vector.broadcast %1 : vector<1x512xf32> to vector<8x512xf32>
    %21 = arith.addf %19, %20 : vector<8x512xf32>
    %22 = arith.index_cast %15 : i32 to index
    %c0_14 = arith.constant 0 : index
    %c0_15 = arith.constant 0 : index
    %23 = vector.load %arg8[%22, %c0_14, %c0_15] : memref<8x8x512xf32, #tpu.memory_space<vmem>>, vector<1x8x512xf32>
    %24 = vector.shape_cast %23 : vector<1x8x512xf32> to vector<8x512xf32>
    %25 = vector.shape_cast %21 : vector<8x512xf32> to vector<1x8x512xf32>
    tpu.vector_store %arg8[%22, %c0_14, %c0_15], %25 {strides = array<i32>} : memref<8x8x512xf32, #tpu.memory_space<vmem>>, vector<1x8x512xf32>,
    %c2_i32 = arith.constant 2 : i32
    %c1_i32_16 = arith.constant 1 : i32
    %26 = arith.muli %c2_i32, %c1_i32_16 : i32
    %c0_i32_17 = arith.constant 0 : i32
    %27 = arith.addi %c0_i32_17, %26 : i32
    %28 = arith.index_cast %27 : i32 to index
    %c0_18 = arith.constant 0 : index
    %c0_19 = arith.constant 0 : index
    %29 = vector.load %arg1[%28, %c0_18, %c0_19] : memref<8x8x16xf32, #tpu.memory_space<vmem>>, vector<1x8x16xf32>
    %30 = vector.shape_cast %29 : vector<1x8x16xf32> to vector<8x16xf32>
    %cst_20 = arith.constant dense<0.000000e+00> : vector<8x512xf32>
    %31 = tpu.matmul %30, %0, %cst_20 {dimension_numbers = #tpu.dot_dimension_numbers<[1], [0], [0], [1], [0, 0, 1, 1], [], []>} : vector<8x16xf32>, vector<16x512xf32>, vector<8x512xf32> -> vector<8x512xf32>
    %32 = vector.broadcast %1 : vector<1x512xf32> to vector<8x512xf32>
    %33 = arith.addf %31, %32 : vector<8x512xf32>
    %34 = arith.index_cast %27 : i32 to index
    %c0_21 = arith.constant 0 : index
    %c0_22 = arith.constant 0 : index
    %35 = vector.load %arg8[%34, %c0_21, %c0_22] : memref<8x8x512xf32, #tpu.memory_space<vmem>>, vector<1x8x512xf32>
    %36 = vector.shape_cast %35 : vector<1x8x512xf32> to vector<8x512xf32>
    %37 = vector.shape_cast %33 : vector<8x512xf32> to vector<1x8x512xf32>
    tpu.vector_store %arg8[%34, %c0_21, %c0_22], %37 {strides = array<i32>} : memref<8x8x512xf32, #tpu.memory_space<vmem>>, vector<1x8x512xf32>,
    %c3_i32 = arith.constant 3 : i32
    %c1_i32_23 = arith.constant 1 : i32
    %38 = arith.muli %c3_i32, %c1_i32_23 : i32
    %c0_i32_24 = arith.constant 0 : i32
    %39 = arith.addi %c0_i32_24, %38 : i32
    %40 = arith.index_cast %39 : i32 to index
    %c0_25 = arith.constant 0 : index
    %c0_26 = arith.constant 0 : index
    %41 = vector.load %arg1[%40, %c0_25, %c0_26] : memref<8x8x16xf32, #tpu.memory_space<vmem>>, vector<1x8x16xf32>
    %42 = vector.shape_cast %41 : vector<1x8x16xf32> to vector<8x16xf32>
    %cst_27 = arith.constant dense<0.000000e+00> : vector<8x512xf32>
    %43 = tpu.matmul %42, %0, %cst_27 {dimension_numbers = #tpu.dot_dimension_numbers<[1], [0], [0], [1], [0, 0, 1, 1], [], []>} : vector<8x16xf32>, vector<16x512xf32>, vector<8x512xf32> -> vector<8x512xf32>
    %44 = vector.broadcast %1 : vector<1x512xf32> to vector<8x512xf32>
    %45 = arith.addf %43, %44 : vector<8x512xf32>
    %46 = arith.index_cast %39 : i32 to index
    %c0_28 = arith.constant 0 : index
    %c0_29 = arith.constant 0 : index
    %47 = vector.load %arg8[%46, %c0_28, %c0_29] : memref<8x8x512xf32, #tpu.memory_space<vmem>>, vector<1x8x512xf32>
    %48 = vector.shape_cast %47 : vector<1x8x512xf32> to vector<8x512xf32>
    %49 = vector.shape_cast %45 : vector<8x512xf32> to vector<1x8x512xf32>
    tpu.vector_store %arg8[%46, %c0_28, %c0_29], %49 {strides = array<i32>} : memref<8x8x512xf32, #tpu.memory_space<vmem>>, vector<1x8x512xf32>,
    %c4_i32 = arith.constant 4 : i32
    %c1_i32_30 = arith.constant 1 : i32
    %50 = arith.muli %c4_i32, %c1_i32_30 : i32
    %c0_i32_31 = arith.constant 0 : i32
    %51 = arith.addi %c0_i32_31, %50 : i32
    %52 = arith.index_cast %51 : i32 to index
    %c0_32 = arith.constant 0 : index
    %c0_33 = arith.constant 0 : index
    %53 = vector.load %arg1[%52, %c0_32, %c0_33] : memref<8x8x16xf32, #tpu.memory_space<vmem>>, vector<1x8x16xf32>
    %54 = vector.shape_cast %53 : vector<1x8x16xf32> to vector<8x16xf32>
    %cst_34 = arith.constant dense<0.000000e+00> : vector<8x512xf32>
    %55 = tpu.matmul %54, %0, %cst_34 {dimension_numbers = #tpu.dot_dimension_numbers<[1], [0], [0], [1], [0, 0, 1, 1], [], []>} : vector<8x16xf32>, vector<16x512xf32>, vector<8x512xf32> -> vector<8x512xf32>
    %56 = vector.broadcast %1 : vector<1x512xf32> to vector<8x512xf32>
    %57 = arith.addf %55, %56 : vector<8x512xf32>
    %58 = arith.index_cast %51 : i32 to index
    %c0_35 = arith.constant 0 : index
    %c0_36 = arith.constant 0 : index
    %59 = vector.load %arg8[%58, %c0_35, %c0_36] : memref<8x8x512xf32, #tpu.memory_space<vmem>>, vector<1x8x512xf32>
    %60 = vector.shape_cast %59 : vector<1x8x512xf32> to vector<8x512xf32>
    %61 = vector.shape_cast %57 : vector<8x512xf32> to vector<1x8x512xf32>
    tpu.vector_store %arg8[%58, %c0_35, %c0_36], %61 {strides = array<i32>} : memref<8x8x512xf32, #tpu.memory_space<vmem>>, vector<1x8x512xf32>,
    %c5_i32 = arith.constant 5 : i32
    %c1_i32_37 = arith.constant 1 : i32
    %62 = arith.muli %c5_i32, %c1_i32_37 : i32
    %c0_i32_38 = arith.constant 0 : i32
    %63 = arith.addi %c0_i32_38, %62 : i32
    %64 = arith.index_cast %63 : i32 to index
    %c0_39 = arith.constant 0 : index
    %c0_40 = arith.constant 0 : index
    %65 = vector.load %arg1[%64, %c0_39, %c0_40] : memref<8x8x16xf32, #tpu.memory_space<vmem>>, vector<1x8x16xf32>
    %66 = vector.shape_cast %65 : vector<1x8x16xf32> to vector<8x16xf32>
    %cst_41 = arith.constant dense<0.000000e+00> : vector<8x512xf32>
    %67 = tpu.matmul %66, %0, %cst_41 {dimension_numbers = #tpu.dot_dimension_numbers<[1], [0], [0], [1], [0, 0, 1, 1], [], []>} : vector<8x16xf32>, vector<16x512xf32>, vector<8x512xf32> -> vector<8x512xf32>
    %68 = vector.broadcast %1 : vector<1x512xf32> to vector<8x512xf32>
    %69 = arith.addf %67, %68 : vector<8x512xf32>
    %70 = arith.index_cast %63 : i32 to index
    %c0_42 = arith.constant 0 : index
    %c0_43 = arith.constant 0 : index
    %71 = vector.load %arg8[%70, %c0_42, %c0_43] : memref<8x8x512xf32, #tpu.memory_space<vmem>>, vector<1x8x512xf32>
    %72 = vector.shape_cast %71 : vector<1x8x512xf32> to vector<8x512xf32>
    %73 = vector.shape_cast %69 : vector<8x512xf32> to vector<1x8x512xf32>
    tpu.vector_store %arg8[%70, %c0_42, %c0_43], %73 {strides = array<i32>} : memref<8x8x512xf32, #tpu.memory_space<vmem>>, vector<1x8x512xf32>,
    %c6_i32 = arith.constant 6 : i32
    %c1_i32_44 = arith.constant 1 : i32
    %74 = arith.muli %c6_i32, %c1_i32_44 : i32
    %c0_i32_45 = arith.constant 0 : i32
    %75 = arith.addi %c0_i32_45, %74 : i32
    %76 = arith.index_cast %75 : i32 to index
    %c0_46 = arith.constant 0 : index
    %c0_47 = arith.constant 0 : index
    %77 = vector.load %arg1[%76, %c0_46, %c0_47] : memref<8x8x16xf32, #tpu.memory_space<vmem>>, vector<1x8x16xf32>
    %78 = vector.shape_cast %77 : vector<1x8x16xf32> to vector<8x16xf32>
    %cst_48 = arith.constant dense<0.000000e+00> : vector<8x512xf32>
    %79 = tpu.matmul %78, %0, %cst_48 {dimension_numbers = #tpu.dot_dimension_numbers<[1], [0], [0], [1], [0, 0, 1, 1], [], []>} : vector<8x16xf32>, vector<16x512xf32>, vector<8x512xf32> -> vector<8x512xf32>
    %80 = vector.broadcast %1 : vector<1x512xf32> to vector<8x512xf32>
    %81 = arith.addf %79, %80 : vector<8x512xf32>
    %82 = arith.index_cast %75 : i32 to index
    %c0_49 = arith.constant 0 : index
    %c0_50 = arith.constant 0 : index
    %83 = vector.load %arg8[%82, %c0_49, %c0_50] : memref<8x8x512xf32, #tpu.memory_space<vmem>>, vector<1x8x512xf32>
    %84 = vector.shape_cast %83 : vector<1x8x512xf32> to vector<8x512xf32>
    %85 = vector.shape_cast %81 : vector<8x512xf32> to vector<1x8x512xf32>
    tpu.vector_store %arg8[%82, %c0_49, %c0_50], %85 {strides = array<i32>} : memref<8x8x512xf32, #tpu.memory_space<vmem>>, vector<1x8x512xf32>,
    %c7_i32 = arith.constant 7 : i32
    %c1_i32_51 = arith.constant 1 : i32
    %86 = arith.muli %c7_i32, %c1_i32_51 : i32
    %c0_i32_52 = arith.constant 0 : i32
    %87 = arith.addi %c0_i32_52, %86 : i32
    %88 = arith.index_cast %87 : i32 to index
    %c0_53 = arith.constant 0 : index
    %c0_54 = arith.constant 0 : index
    %89 = vector.load %arg1[%88, %c0_53, %c0_54] : memref<8x8x16xf32, #tpu.memory_space<vmem>>, vector<1x8x16xf32>
    %90 = vector.shape_cast %89 : vector<1x8x16xf32> to vector<8x16xf32>
    %cst_55 = arith.constant dense<0.000000e+00> : vector<8x512xf32>
    %91 = tpu.matmul %90, %0, %cst_55 {dimension_numbers = #tpu.dot_dimension_numbers<[1], [0], [0], [1], [0, 0, 1, 1], [], []>} : vector<8x16xf32>, vector<16x512xf32>, vector<8x512xf32> -> vector<8x512xf32>
    %92 = vector.broadcast %1 : vector<1x512xf32> to vector<8x512xf32>
    %93 = arith.addf %91, %92 : vector<8x512xf32>
    %94 = arith.index_cast %87 : i32 to index
    %c0_56 = arith.constant 0 : index
    %c0_57 = arith.constant 0 : index
    %95 = vector.load %arg8[%94, %c0_56, %c0_57] : memref<8x8x512xf32, #tpu.memory_space<vmem>>, vector<1x8x512xf32>
    %96 = vector.shape_cast %95 : vector<1x8x512xf32> to vector<8x512xf32>
    %97 = vector.shape_cast %93 : vector<8x512xf32> to vector<1x8x512xf32>
    tpu.vector_store %arg8[%94, %c0_56, %c0_57], %97 {strides = array<i32>} : memref<8x8x512xf32, #tpu.memory_space<vmem>>, vector<1x8x512xf32>,
    %c8_i32 = arith.constant 8 : i32
    %c7 = arith.constant 7 : index
    %c0_58 = arith.constant 0 : index
    %c0_59 = arith.constant 0 : index
    %98 = vector.load %arg1[%c7, %c0_58, %c0_59] : memref<8x8x16xf32, #tpu.memory_space<vmem>>, vector<1x8x16xf32>
    %99 = vector.shape_cast %98 : vector<1x8x16xf32> to vector<8x16xf32>
    %c0_60 = arith.constant 0 : index
    %c0_61 = arith.constant 0 : index
    %100 = vector.load %arg5[%c0_60, %c0_61] : memref<16x384xf32, #tpu.memory_space<vmem>>, vector<16x384xf32>
    %cst_62 = arith.constant dense<0.000000e+00> : vector<8x384xf32>
    %101 = tpu.matmul %99, %100, %cst_62 {dimension_numbers = #tpu.dot_dimension_numbers<[1], [0], [0], [1], [0, 0, 1, 1], [], []>} : vector<8x16xf32>, vector<16x384xf32>, vector<8x384xf32> -> vector<8x384xf32>
    %c0_63 = arith.constant 0 : index
    %c0_64 = arith.constant 0 : index
    %102 = vector.load %arg6[%c0_63, %c0_64] : memref<1x384xf32, #tpu.memory_space<vmem>>, vector<1x384xf32>
    %103 = vector.broadcast %102 : vector<1x384xf32> to vector<8x384xf32>
    %104 = arith.addf %101, %103 : vector<8x384xf32>
    %105 = vector.extract_strided_slice %104 {offsets = [0, 0], sizes = [8, 128], strides = [1, 1]} : vector<8x384xf32> to vector<8x128xf32>
    %106 = arith.negf %105 : vector<8x128xf32>
    %107 = math.exp %106 : vector<8x128xf32>
    %cst_65 = arith.constant 1.000000e+00 : f32
    %108 = vector.broadcast %cst_65 : f32 to vector<8x128xf32>
    %109 = arith.addf %108, %107 : vector<8x128xf32>
    %110 = arith.divf %108, %109 : vector<8x128xf32>
    %111 = vector.extract_strided_slice %104 {offsets = [0, 128], sizes = [8, 128], strides = [1, 1]} : vector<8x384xf32> to vector<8x128xf32>
    %112 = math.tanh %111 : vector<8x128xf32>
    %113 = vector.extract_strided_slice %104 {offsets = [0, 256], sizes = [8, 128], strides = [1, 1]} : vector<8x384xf32> to vector<8x128xf32>
    %114 = arith.negf %113 : vector<8x128xf32>
    %115 = math.exp %114 : vector<8x128xf32>
    %cst_66 = arith.constant 1.000000e+00 : f32
    %116 = vector.broadcast %cst_66 : f32 to vector<8x128xf32>
    %117 = arith.addf %116, %115 : vector<8x128xf32>
    %118 = arith.divf %116, %117 : vector<8x128xf32>
    %119 = arith.mulf %110, %112 : vector<8x128xf32>
    %120 = math.tanh %119 : vector<8x128xf32>
    %121 = arith.mulf %118, %120 : vector<8x128xf32>
    %c0_67 = arith.constant 0 : index
    %c128 = arith.constant 128 : index
    %122 = vector.load %arg7[%c0_67, %c128] : memref<8x256xf32, #tpu.memory_space<vmem>>, vector<8x128xf32>
    tpu.vector_store %arg7[%c0_67, %c128], %121 {strides = array<i32>} : memref<8x256xf32, #tpu.memory_space<vmem>>, vector<8x128xf32>,
    %cst_68 = arith.constant 0.000000e+00 : f32
    %123 = vector.broadcast %cst_68 : f32 to vector<8x128xf32>
    %cst_69 = arith.constant 0.000000e+00 : f32
    %124 = vector.broadcast %cst_69 : f32 to vector<8x128xf32>
    %c0_i32_70 = arith.constant 0 : i32
    %125 = arith.index_cast %c0_i32_70 : i32 to index
    %c0_71 = arith.constant 0 : index
    %c0_72 = arith.constant 0 : index
    %126 = vector.load %arg8[%125, %c0_71, %c0_72] : memref<8x8x512xf32, #tpu.memory_space<vmem>>, vector<1x8x512xf32>
    %127 = vector.shape_cast %126 : vector<1x8x512xf32> to vector<8x512xf32>
    %c0_73 = arith.constant 0 : index
    %c0_74 = arith.constant 0 : index
    %128 = vector.load %arg3[%c0_73, %c0_74] : memref<128x512xf32, #tpu.memory_space<vmem>>, vector<128x512xf32>
    %cst_75 = arith.constant dense<0.000000e+00> : vector<8x512xf32>
    %129 = tpu.matmul %123, %128, %cst_75 {dimension_numbers = #tpu.dot_dimension_numbers<[1], [0], [0], [1], [0, 0, 1, 1], [], []>} : vector<8x128xf32>, vector<128x512xf32>, vector<8x512xf32> -> vector<8x512xf32>
    %130 = arith.addf %127, %129 : vector<8x512xf32>
    %131 = vector.extract_strided_slice %130 {offsets = [0, 0], sizes = [8, 128], strides = [1, 1]} : vector<8x512xf32> to vector<8x128xf32>
    %132 = arith.negf %131 : vector<8x128xf32>
    %133 = math.exp %132 : vector<8x128xf32>
    %cst_76 = arith.constant 1.000000e+00 : f32
    %134 = vector.broadcast %cst_76 : f32 to vector<8x128xf32>
    %135 = arith.addf %134, %133 : vector<8x128xf32>
    %136 = arith.divf %134, %135 : vector<8x128xf32>
    %137 = vector.extract_strided_slice %130 {offsets = [0, 128], sizes = [8, 128], strides = [1, 1]} : vector<8x512xf32> to vector<8x128xf32>
    %138 = arith.negf %137 : vector<8x128xf32>
    %139 = math.exp %138 : vector<8x128xf32>
    %cst_77 = arith.constant 1.000000e+00 : f32
    %140 = vector.broadcast %cst_77 : f32 to vector<8x128xf32>
    %141 = arith.addf %140, %139 : vector<8x128xf32>
    %142 = arith.divf %140, %141 : vector<8x128xf32>
    %143 = vector.extract_strided_slice %130 {offsets = [0, 256], sizes = [8, 128], strides = [1, 1]} : vector<8x512xf32> to vector<8x128xf32>
    %144 = math.tanh %143 : vector<8x128xf32>
    %145 = vector.extract_strided_slice %130 {offsets = [0, 384], sizes = [8, 128], strides = [1, 1]} : vector<8x512xf32> to vector<8x128xf32>
    %146 = arith.negf %145 : vector<8x128xf32>
    %147 = math.exp %146 : vector<8x128xf32>
    %cst_78 = arith.constant 1.000000e+00 : f32
    %148 = vector.broadcast %cst_78 : f32 to vector<8x128xf32>
    %149 = arith.addf %148, %147 : vector<8x128xf32>
    %150 = arith.divf %148, %149 : vector<8x128xf32>
    %151 = arith.mulf %142, %124 : vector<8x128xf32>
    %152 = arith.mulf %136, %144 : vector<8x128xf32>
    %153 = arith.addf %151, %152 : vector<8x128xf32>
    %154 = math.tanh %153 : vector<8x128xf32>
    %155 = arith.mulf %150, %154 : vector<8x128xf32>
    %c1_i32_79 = arith.constant 1 : i32
    %156 = arith.index_cast %c1_i32_79 : i32 to index
    %c0_80 = arith.constant 0 : index
    %c0_81 = arith.constant 0 : index
    %157 = vector.load %arg8[%156, %c0_80, %c0_81] : memref<8x8x512xf32, #tpu.memory_space<vmem>>, vector<1x8x512xf32>
    %158 = vector.shape_cast %157 : vector<1x8x512xf32> to vector<8x512xf32>
    %c0_82 = arith.constant 0 : index
    %c0_83 = arith.constant 0 : index
    %159 = vector.load %arg3[%c0_82, %c0_83] : memref<128x512xf32, #tpu.memory_space<vmem>>, vector<128x512xf32>
    %cst_84 = arith.constant dense<0.000000e+00> : vector<8x512xf32>
    %160 = tpu.matmul %155, %159, %cst_84 {dimension_numbers = #tpu.dot_dimension_numbers<[1], [0], [0], [1], [0, 0, 1, 1], [], []>} : vector<8x128xf32>, vector<128x512xf32>, vector<8x512xf32> -> vector<8x512xf32>
    %161 = arith.addf %158, %160 : vector<8x512xf32>
    %162 = vector.extract_strided_slice %161 {offsets = [0, 0], sizes = [8, 128], strides = [1, 1]} : vector<8x512xf32> to vector<8x128xf32>
    %163 = arith.negf %162 : vector<8x128xf32>
    %164 = math.exp %163 : vector<8x128xf32>
    %cst_85 = arith.constant 1.000000e+00 : f32
    %165 = vector.broadcast %cst_85 : f32 to vector<8x128xf32>
    %166 = arith.addf %165, %164 : vector<8x128xf32>
    %167 = arith.divf %165, %166 : vector<8x128xf32>
    %168 = vector.extract_strided_slice %161 {offsets = [0, 128], sizes = [8, 128], strides = [1, 1]} : vector<8x512xf32> to vector<8x128xf32>
    %169 = arith.negf %168 : vector<8x128xf32>
    %170 = math.exp %169 : vector<8x128xf32>
    %cst_86 = arith.constant 1.000000e+00 : f32
    %171 = vector.broadcast %cst_86 : f32 to vector<8x128xf32>
    %172 = arith.addf %171, %170 : vector<8x128xf32>
    %173 = arith.divf %171, %172 : vector<8x128xf32>
    %174 = vector.extract_strided_slice %161 {offsets = [0, 256], sizes = [8, 128], strides = [1, 1]} : vector<8x512xf32> to vector<8x128xf32>
    %175 = math.tanh %174 : vector<8x128xf32>
    %176 = vector.extract_strided_slice %161 {offsets = [0, 384], sizes = [8, 128], strides = [1, 1]} : vector<8x512xf32> to vector<8x128xf32>
    %177 = arith.negf %176 : vector<8x128xf32>
    %178 = math.exp %177 : vector<8x128xf32>
    %cst_87 = arith.constant 1.000000e+00 : f32
    %179 = vector.broadcast %cst_87 : f32 to vector<8x128xf32>
    %180 = arith.addf %179, %178 : vector<8x128xf32>
    %181 = arith.divf %179, %180 : vector<8x128xf32>
    %182 = arith.mulf %173, %153 : vector<8x128xf32>
    %183 = arith.mulf %167, %175 : vector<8x128xf32>
    %184 = arith.addf %182, %183 : vector<8x128xf32>
    %185 = math.tanh %184 : vector<8x128xf32>
    %186 = arith.mulf %181, %185 : vector<8x128xf32>
    %c2_i32_88 = arith.constant 2 : i32
    %187 = arith.index_cast %c2_i32_88 : i32 to index
    %c0_89 = arith.constant 0 : index
    %c0_90 = arith.constant 0 : index
    %188 = vector.load %arg8[%187, %c0_89, %c0_90] : memref<8x8x512xf32, #tpu.memory_space<vmem>>, vector<1x8x512xf32>
    %189 = vector.shape_cast %188 : vector<1x8x512xf32> to vector<8x512xf32>
    %c0_91 = arith.constant 0 : index
    %c0_92 = arith.constant 0 : index
    %190 = vector.load %arg3[%c0_91, %c0_92] : memref<128x512xf32, #tpu.memory_space<vmem>>, vector<128x512xf32>
    %cst_93 = arith.constant dense<0.000000e+00> : vector<8x512xf32>
    %191 = tpu.matmul %186, %190, %cst_93 {dimension_numbers = #tpu.dot_dimension_numbers<[1], [0], [0], [1], [0, 0, 1, 1], [], []>} : vector<8x128xf32>, vector<128x512xf32>, vector<8x512xf32> -> vector<8x512xf32>
    %192 = arith.addf %189, %191 : vector<8x512xf32>
    %193 = vector.extract_strided_slice %192 {offsets = [0, 0], sizes = [8, 128], strides = [1, 1]} : vector<8x512xf32> to vector<8x128xf32>
    %194 = arith.negf %193 : vector<8x128xf32>
    %195 = math.exp %194 : vector<8x128xf32>
    %cst_94 = arith.constant 1.000000e+00 : f32
    %196 = vector.broadcast %cst_94 : f32 to vector<8x128xf32>
    %197 = arith.addf %196, %195 : vector<8x128xf32>
    %198 = arith.divf %196, %197 : vector<8x128xf32>
    %199 = vector.extract_strided_slice %192 {offsets = [0, 128], sizes = [8, 128], strides = [1, 1]} : vector<8x512xf32> to vector<8x128xf32>
    %200 = arith.negf %199 : vector<8x128xf32>
    %201 = math.exp %200 : vector<8x128xf32>
    %cst_95 = arith.constant 1.000000e+00 : f32
    %202 = vector.broadcast %cst_95 : f32 to vector<8x128xf32>
    %203 = arith.addf %202, %201 : vector<8x128xf32>
    %204 = arith.divf %202, %203 : vector<8x128xf32>
    %205 = vector.extract_strided_slice %192 {offsets = [0, 256], sizes = [8, 128], strides = [1, 1]} : vector<8x512xf32> to vector<8x128xf32>
    %206 = math.tanh %205 : vector<8x128xf32>
    %207 = vector.extract_strided_slice %192 {offsets = [0, 384], sizes = [8, 128], strides = [1, 1]} : vector<8x512xf32> to vector<8x128xf32>
    %208 = arith.negf %207 : vector<8x128xf32>
    %209 = math.exp %208 : vector<8x128xf32>
    %cst_96 = arith.constant 1.000000e+00 : f32
    %210 = vector.broadcast %cst_96 : f32 to vector<8x128xf32>
    %211 = arith.addf %210, %209 : vector<8x128xf32>
    %212 = arith.divf %210, %211 : vector<8x128xf32>
    %213 = arith.mulf %204, %184 : vector<8x128xf32>
    %214 = arith.mulf %198, %206 : vector<8x128xf32>
    %215 = arith.addf %213, %214 : vector<8x128xf32>
    %216 = math.tanh %215 : vector<8x128xf32>
    %217 = arith.mulf %212, %216 : vector<8x128xf32>
    %c3_i32_97 = arith.constant 3 : i32
    %218 = arith.index_cast %c3_i32_97 : i32 to index
    %c0_98 = arith.constant 0 : index
    %c0_99 = arith.constant 0 : index
    %219 = vector.load %arg8[%218, %c0_98, %c0_99] : memref<8x8x512xf32, #tpu.memory_space<vmem>>, vector<1x8x512xf32>
    %220 = vector.shape_cast %219 : vector<1x8x512xf32> to vector<8x512xf32>
    %c0_100 = arith.constant 0 : index
    %c0_101 = arith.constant 0 : index
    %221 = vector.load %arg3[%c0_100, %c0_101] : memref<128x512xf32, #tpu.memory_space<vmem>>, vector<128x512xf32>
    %cst_102 = arith.constant dense<0.000000e+00> : vector<8x512xf32>
    %222 = tpu.matmul %217, %221, %cst_102 {dimension_numbers = #tpu.dot_dimension_numbers<[1], [0], [0], [1], [0, 0, 1, 1], [], []>} : vector<8x128xf32>, vector<128x512xf32>, vector<8x512xf32> -> vector<8x512xf32>
    %223 = arith.addf %220, %222 : vector<8x512xf32>
    %224 = vector.extract_strided_slice %223 {offsets = [0, 0], sizes = [8, 128], strides = [1, 1]} : vector<8x512xf32> to vector<8x128xf32>
    %225 = arith.negf %224 : vector<8x128xf32>
    %226 = math.exp %225 : vector<8x128xf32>
    %cst_103 = arith.constant 1.000000e+00 : f32
    %227 = vector.broadcast %cst_103 : f32 to vector<8x128xf32>
    %228 = arith.addf %227, %226 : vector<8x128xf32>
    %229 = arith.divf %227, %228 : vector<8x128xf32>
    %230 = vector.extract_strided_slice %223 {offsets = [0, 128], sizes = [8, 128], strides = [1, 1]} : vector<8x512xf32> to vector<8x128xf32>
    %231 = arith.negf %230 : vector<8x128xf32>
    %232 = math.exp %231 : vector<8x128xf32>
    %cst_104 = arith.constant 1.000000e+00 : f32
    %233 = vector.broadcast %cst_104 : f32 to vector<8x128xf32>
    %234 = arith.addf %233, %232 : vector<8x128xf32>
    %235 = arith.divf %233, %234 : vector<8x128xf32>
    %236 = vector.extract_strided_slice %223 {offsets = [0, 256], sizes = [8, 128], strides = [1, 1]} : vector<8x512xf32> to vector<8x128xf32>
    %237 = math.tanh %236 : vector<8x128xf32>
    %238 = vector.extract_strided_slice %223 {offsets = [0, 384], sizes = [8, 128], strides = [1, 1]} : vector<8x512xf32> to vector<8x128xf32>
    %239 = arith.negf %238 : vector<8x128xf32>
    %240 = math.exp %239 : vector<8x128xf32>
    %cst_105 = arith.constant 1.000000e+00 : f32
    %241 = vector.broadcast %cst_105 : f32 to vector<8x128xf32>
    %242 = arith.addf %241, %240 : vector<8x128xf32>
    %243 = arith.divf %241, %242 : vector<8x128xf32>
    %244 = arith.mulf %235, %215 : vector<8x128xf32>
    %245 = arith.mulf %229, %237 : vector<8x128xf32>
    %246 = arith.addf %244, %245 : vector<8x128xf32>
    %247 = math.tanh %246 : vector<8x128xf32>
    %248 = arith.mulf %243, %247 : vector<8x128xf32>
    %c4_i32_106 = arith.constant 4 : i32
    %249 = arith.index_cast %c4_i32_106 : i32 to index
    %c0_107 = arith.constant 0 : index
    %c0_108 = arith.constant 0 : index
    %250 = vector.load %arg8[%249, %c0_107, %c0_108] : memref<8x8x512xf32, #tpu.memory_space<vmem>>, vector<1x8x512xf32>
    %251 = vector.shape_cast %250 : vector<1x8x512xf32> to vector<8x512xf32>
    %c0_109 = arith.constant 0 : index
    %c0_110 = arith.constant 0 : index
    %252 = vector.load %arg3[%c0_109, %c0_110] : memref<128x512xf32, #tpu.memory_space<vmem>>, vector<128x512xf32>
    %cst_111 = arith.constant dense<0.000000e+00> : vector<8x512xf32>
    %253 = tpu.matmul %248, %252, %cst_111 {dimension_numbers = #tpu.dot_dimension_numbers<[1], [0], [0], [1], [0, 0, 1, 1], [], []>} : vector<8x128xf32>, vector<128x512xf32>, vector<8x512xf32> -> vector<8x512xf32>
    %254 = arith.addf %251, %253 : vector<8x512xf32>
    %255 = vector.extract_strided_slice %254 {offsets = [0, 0], sizes = [8, 128], strides = [1, 1]} : vector<8x512xf32> to vector<8x128xf32>
    %256 = arith.negf %255 : vector<8x128xf32>
    %257 = math.exp %256 : vector<8x128xf32>
    %cst_112 = arith.constant 1.000000e+00 : f32
    %258 = vector.broadcast %cst_112 : f32 to vector<8x128xf32>
    %259 = arith.addf %258, %257 : vector<8x128xf32>
    %260 = arith.divf %258, %259 : vector<8x128xf32>
    %261 = vector.extract_strided_slice %254 {offsets = [0, 128], sizes = [8, 128], strides = [1, 1]} : vector<8x512xf32> to vector<8x128xf32>
    %262 = arith.negf %261 : vector<8x128xf32>
    %263 = math.exp %262 : vector<8x128xf32>
    %cst_113 = arith.constant 1.000000e+00 : f32
    %264 = vector.broadcast %cst_113 : f32 to vector<8x128xf32>
    %265 = arith.addf %264, %263 : vector<8x128xf32>
    %266 = arith.divf %264, %265 : vector<8x128xf32>
    %267 = vector.extract_strided_slice %254 {offsets = [0, 256], sizes = [8, 128], strides = [1, 1]} : vector<8x512xf32> to vector<8x128xf32>
    %268 = math.tanh %267 : vector<8x128xf32>
    %269 = vector.extract_strided_slice %254 {offsets = [0, 384], sizes = [8, 128], strides = [1, 1]} : vector<8x512xf32> to vector<8x128xf32>
    %270 = arith.negf %269 : vector<8x128xf32>
    %271 = math.exp %270 : vector<8x128xf32>
    %cst_114 = arith.constant 1.000000e+00 : f32
    %272 = vector.broadcast %cst_114 : f32 to vector<8x128xf32>
    %273 = arith.addf %272, %271 : vector<8x128xf32>
    %274 = arith.divf %272, %273 : vector<8x128xf32>
    %275 = arith.mulf %266, %246 : vector<8x128xf32>
    %276 = arith.mulf %260, %268 : vector<8x128xf32>
    %277 = arith.addf %275, %276 : vector<8x128xf32>
    %278 = math.tanh %277 : vector<8x128xf32>
    %279 = arith.mulf %274, %278 : vector<8x128xf32>
    %c5_i32_115 = arith.constant 5 : i32
    %280 = arith.index_cast %c5_i32_115 : i32 to index
    %c0_116 = arith.constant 0 : index
    %c0_117 = arith.constant 0 : index
    %281 = vector.load %arg8[%280, %c0_116, %c0_117] : memref<8x8x512xf32, #tpu.memory_space<vmem>>, vector<1x8x512xf32>
    %282 = vector.shape_cast %281 : vector<1x8x512xf32> to vector<8x512xf32>
    %c0_118 = arith.constant 0 : index
    %c0_119 = arith.constant 0 : index
    %283 = vector.load %arg3[%c0_118, %c0_119] : memref<128x512xf32, #tpu.memory_space<vmem>>, vector<128x512xf32>
    %cst_120 = arith.constant dense<0.000000e+00> : vector<8x512xf32>
    %284 = tpu.matmul %279, %283, %cst_120 {dimension_numbers = #tpu.dot_dimension_numbers<[1], [0], [0], [1], [0, 0, 1, 1], [], []>} : vector<8x128xf32>, vector<128x512xf32>, vector<8x512xf32> -> vector<8x512xf32>
    %285 = arith.addf %282, %284 : vector<8x512xf32>
    %286 = vector.extract_strided_slice %285 {offsets = [0, 0], sizes = [8, 128], strides = [1, 1]} : vector<8x512xf32> to vector<8x128xf32>
    %287 = arith.negf %286 : vector<8x128xf32>
    %288 = math.exp %287 : vector<8x128xf32>
    %cst_121 = arith.constant 1.000000e+00 : f32
    %289 = vector.broadcast %cst_121 : f32 to vector<8x128xf32>
    %290 = arith.addf %289, %288 : vector<8x128xf32>
    %291 = arith.divf %289, %290 : vector<8x128xf32>
    %292 = vector.extract_strided_slice %285 {offsets = [0, 128], sizes = [8, 128], strides = [1, 1]} : vector<8x512xf32> to vector<8x128xf32>
    %293 = arith.negf %292 : vector<8x128xf32>
    %294 = math.exp %293 : vector<8x128xf32>
    %cst_122 = arith.constant 1.000000e+00 : f32
    %295 = vector.broadcast %cst_122 : f32 to vector<8x128xf32>
    %296 = arith.addf %295, %294 : vector<8x128xf32>
    %297 = arith.divf %295, %296 : vector<8x128xf32>
    %298 = vector.extract_strided_slice %285 {offsets = [0, 256], sizes = [8, 128], strides = [1, 1]} : vector<8x512xf32> to vector<8x128xf32>
    %299 = math.tanh %298 : vector<8x128xf32>
    %300 = vector.extract_strided_slice %285 {offsets = [0, 384], sizes = [8, 128], strides = [1, 1]} : vector<8x512xf32> to vector<8x128xf32>
    %301 = arith.negf %300 : vector<8x128xf32>
    %302 = math.exp %301 : vector<8x128xf32>
    %cst_123 = arith.constant 1.000000e+00 : f32
    %303 = vector.broadcast %cst_123 : f32 to vector<8x128xf32>
    %304 = arith.addf %303, %302 : vector<8x128xf32>
    %305 = arith.divf %303, %304 : vector<8x128xf32>
    %306 = arith.mulf %297, %277 : vector<8x128xf32>
    %307 = arith.mulf %291, %299 : vector<8x128xf32>
    %308 = arith.addf %306, %307 : vector<8x128xf32>
    %309 = math.tanh %308 : vector<8x128xf32>
    %310 = arith.mulf %305, %309 : vector<8x128xf32>
    %c6_i32_124 = arith.constant 6 : i32
    %311 = arith.index_cast %c6_i32_124 : i32 to index
    %c0_125 = arith.constant 0 : index
    %c0_126 = arith.constant 0 : index
    %312 = vector.load %arg8[%311, %c0_125, %c0_126] : memref<8x8x512xf32, #tpu.memory_space<vmem>>, vector<1x8x512xf32>
    %313 = vector.shape_cast %312 : vector<1x8x512xf32> to vector<8x512xf32>
    %c0_127 = arith.constant 0 : index
    %c0_128 = arith.constant 0 : index
    %314 = vector.load %arg3[%c0_127, %c0_128] : memref<128x512xf32, #tpu.memory_space<vmem>>, vector<128x512xf32>
    %cst_129 = arith.constant dense<0.000000e+00> : vector<8x512xf32>
    %315 = tpu.matmul %310, %314, %cst_129 {dimension_numbers = #tpu.dot_dimension_numbers<[1], [0], [0], [1], [0, 0, 1, 1], [], []>} : vector<8x128xf32>, vector<128x512xf32>, vector<8x512xf32> -> vector<8x512xf32>
    %316 = arith.addf %313, %315 : vector<8x512xf32>
    %317 = vector.extract_strided_slice %316 {offsets = [0, 0], sizes = [8, 128], strides = [1, 1]} : vector<8x512xf32> to vector<8x128xf32>
    %318 = arith.negf %317 : vector<8x128xf32>
    %319 = math.exp %318 : vector<8x128xf32>
    %cst_130 = arith.constant 1.000000e+00 : f32
    %320 = vector.broadcast %cst_130 : f32 to vector<8x128xf32>
    %321 = arith.addf %320, %319 : vector<8x128xf32>
    %322 = arith.divf %320, %321 : vector<8x128xf32>
    %323 = vector.extract_strided_slice %316 {offsets = [0, 128], sizes = [8, 128], strides = [1, 1]} : vector<8x512xf32> to vector<8x128xf32>
    %324 = arith.negf %323 : vector<8x128xf32>
    %325 = math.exp %324 : vector<8x128xf32>
    %cst_131 = arith.constant 1.000000e+00 : f32
    %326 = vector.broadcast %cst_131 : f32 to vector<8x128xf32>
    %327 = arith.addf %326, %325 : vector<8x128xf32>
    %328 = arith.divf %326, %327 : vector<8x128xf32>
    %329 = vector.extract_strided_slice %316 {offsets = [0, 256], sizes = [8, 128], strides = [1, 1]} : vector<8x512xf32> to vector<8x128xf32>
    %330 = math.tanh %329 : vector<8x128xf32>
    %331 = vector.extract_strided_slice %316 {offsets = [0, 384], sizes = [8, 128], strides = [1, 1]} : vector<8x512xf32> to vector<8x128xf32>
    %332 = arith.negf %331 : vector<8x128xf32>
    %333 = math.exp %332 : vector<8x128xf32>
    %cst_132 = arith.constant 1.000000e+00 : f32
    %334 = vector.broadcast %cst_132 : f32 to vector<8x128xf32>
    %335 = arith.addf %334, %333 : vector<8x128xf32>
    %336 = arith.divf %334, %335 : vector<8x128xf32>
    %337 = arith.mulf %328, %308 : vector<8x128xf32>
    %338 = arith.mulf %322, %330 : vector<8x128xf32>
    %339 = arith.addf %337, %338 : vector<8x128xf32>
    %340 = math.tanh %339 : vector<8x128xf32>
    %341 = arith.mulf %336, %340 : vector<8x128xf32>
    %c7_i32_133 = arith.constant 7 : i32
    %342 = arith.index_cast %c7_i32_133 : i32 to index
    %c0_134 = arith.constant 0 : index
    %c0_135 = arith.constant 0 : index
    %343 = vector.load %arg8[%342, %c0_134, %c0_135] : memref<8x8x512xf32, #tpu.memory_space<vmem>>, vector<1x8x512xf32>
    %344 = vector.shape_cast %343 : vector<1x8x512xf32> to vector<8x512xf32>
    %c0_136 = arith.constant 0 : index
    %c0_137 = arith.constant 0 : index
    %345 = vector.load %arg3[%c0_136, %c0_137] : memref<128x512xf32, #tpu.memory_space<vmem>>, vector<128x512xf32>
    %cst_138 = arith.constant dense<0.000000e+00> : vector<8x512xf32>
    %346 = tpu.matmul %341, %345, %cst_138 {dimension_numbers = #tpu.dot_dimension_numbers<[1], [0], [0], [1], [0, 0, 1, 1], [], []>} : vector<8x128xf32>, vector<128x512xf32>, vector<8x512xf32> -> vector<8x512xf32>
    %347 = arith.addf %344, %346 : vector<8x512xf32>
    %348 = vector.extract_strided_slice %347 {offsets = [0, 0], sizes = [8, 128], strides = [1, 1]} : vector<8x512xf32> to vector<8x128xf32>
    %349 = arith.negf %348 : vector<8x128xf32>
    %350 = math.exp %349 : vector<8x128xf32>
    %cst_139 = arith.constant 1.000000e+00 : f32
    %351 = vector.broadcast %cst_139 : f32 to vector<8x128xf32>
    %352 = arith.addf %351, %350 : vector<8x128xf32>
    %353 = arith.divf %351, %352 : vector<8x128xf32>
    %354 = vector.extract_strided_slice %347 {offsets = [0, 128], sizes = [8, 128], strides = [1, 1]} : vector<8x512xf32> to vector<8x128xf32>
    %355 = arith.negf %354 : vector<8x128xf32>
    %356 = math.exp %355 : vector<8x128xf32>
    %cst_140 = arith.constant 1.000000e+00 : f32
    %357 = vector.broadcast %cst_140 : f32 to vector<8x128xf32>
    %358 = arith.addf %357, %356 : vector<8x128xf32>
    %359 = arith.divf %357, %358 : vector<8x128xf32>
    %360 = vector.extract_strided_slice %347 {offsets = [0, 256], sizes = [8, 128], strides = [1, 1]} : vector<8x512xf32> to vector<8x128xf32>
    %361 = math.tanh %360 : vector<8x128xf32>
    %362 = vector.extract_strided_slice %347 {offsets = [0, 384], sizes = [8, 128], strides = [1, 1]} : vector<8x512xf32> to vector<8x128xf32>
    %363 = arith.negf %362 : vector<8x128xf32>
    %364 = math.exp %363 : vector<8x128xf32>
    %cst_141 = arith.constant 1.000000e+00 : f32
    %365 = vector.broadcast %cst_141 : f32 to vector<8x128xf32>
    %366 = arith.addf %365, %364 : vector<8x128xf32>
    %367 = arith.divf %365, %366 : vector<8x128xf32>
    %368 = arith.mulf %359, %339 : vector<8x128xf32>
    %369 = arith.mulf %353, %361 : vector<8x128xf32>
    %370 = arith.addf %368, %369 : vector<8x128xf32>
    %371 = math.tanh %370 : vector<8x128xf32>
    %372 = arith.mulf %367, %371 : vector<8x128xf32>
    %c8_i32_142 = arith.constant 8 : i32
    %c0_143 = arith.constant 0 : index
    %c0_144 = arith.constant 0 : index
    %373 = vector.load %arg7[%c0_143, %c0_144] : memref<8x256xf32, #tpu.memory_space<vmem>>, vector<8x128xf32>
    tpu.vector_store %arg7[%c0_143, %c0_144], %372 {strides = array<i32>} : memref<8x256xf32, #tpu.memory_space<vmem>>, vector<8x128xf32>,
    return
  }
  func.func @transform_0(%arg0: i32) -> (i32, i32, i32) {
    %c0_i32 = arith.constant 0 : i32
    %c0_i32_0 = arith.constant 0 : i32
    %c0_i32_1 = arith.constant 0 : i32
    return %c0_i32, %arg0, %c0_i32_0 : i32, i32, i32
  }
  func.func @transform_1(%arg0: i32) -> (i32, i32) {
    %c0_i32 = arith.constant 0 : i32
    %c0_i32_0 = arith.constant 0 : i32
    %c0_i32_1 = arith.constant 0 : i32
    return %c0_i32, %c0_i32_0 : i32, i32
  }
  func.func @transform_2(%arg0: i32) -> (i32, i32) {
    %c0_i32 = arith.constant 0 : i32
    %c0_i32_0 = arith.constant 0 : i32
    %c0_i32_1 = arith.constant 0 : i32
    return %c0_i32, %c0_i32_0 : i32, i32
  }
  func.func @transform_3(%arg0: i32) -> (i32, i32) {
    %c0_i32 = arith.constant 0 : i32
    %c0_i32_0 = arith.constant 0 : i32
    %c0_i32_1 = arith.constant 0 : i32
    return %c0_i32, %c0_i32_0 : i32, i32
  }
  func.func @transform_4(%arg0: i32) -> (i32, i32) {
    %c0_i32 = arith.constant 0 : i32
    %c0_i32_0 = arith.constant 0 : i32
    %c0_i32_1 = arith.constant 0 : i32
    return %c0_i32, %c0_i32_0 : i32, i32
  }
  func.func @transform_5(%arg0: i32) -> (i32, i32) {
    %c0_i32 = arith.constant 0 : i32
    %c0_i32_0 = arith.constant 0 : i32
    %c0_i32_1 = arith.constant 0 : i32
    return %c0_i32, %c0_i32_0 : i32, i32
  }
  func.func @transform_6(%arg0: i32) -> (i32, i32) {
    %c0_i32 = arith.constant 0 : i32
    %c0_i32_0 = arith.constant 0 : i32
    return %arg0, %c0_i32 : i32, i32
  }
}

</mosaic_0001>

<bundles_post_ra>
// kernel: tpu_custom_call.1
= control target key start
LH: loop header
LB: loop body
LE: loop exit
PB: predicated region body
PF: predicated region fallthrough
CT: control target
= control target key end

     0   :  { %11 = vsyncpa [#allocation4], 0  ;;  %s4519_s0 = inlined_call_operand.hbm [shape: f32[8,8,16], index: 0, kind: input, shape index: {}]   ;;  %s4520_s1 = inlined_call_operand.hbm [shape: f32[16,512], index: 1, kind: input, shape index: {}]   ;;  %s4521_s2 = inlined_call_operand.hbm [shape: f32[128,512], index: 2, kind: input, shape index: {}]   ;;  %s4522_s3 = inlined_call_operand.vmem [shape: f32[1,512], index: 3, kind: input, shape index: {}]   ;;  %s4523_s4 = inlined_call_operand.hbm [shape: f32[16,384], index: 4, kind: input, shape index: {}]   ;;  %s4524_s5 = inlined_call_operand.vmem [shape: f32[1,384], index: 5, kind: input, shape index: {}]   ;;  %s4525_s6 = inlined_call_operand.hbm [shape: f32[8,256], index: 6, kind: output, shape index: {}]  }
   0x1   :  { %12 = vsyncpa [#allocation7], 0 }
   0x2   :  { %13 = vsyncpa [#allocation10], 0 }
   0x3   :  { %14 = vsyncpa [#allocation5], 0  ;;  %s3362_s21 = smov [#allocation6]  }
   0x4   :  { %s32_s22 = sshll.u32 %s3362_s21, 4  ;;  %s33_s22 = int_to_ptr.vmem [resolvable:$true] %s32_s22 }
   0x5   :  { %s3262_s23 = scalar_lea.vmem %s33_s22, 1024  ;;  %p3267_p1 = scmp.lt.s32.totalorder %s33_s22, %s33_s22 }
   0x6   :  { %p3263_p0 = scmp.ne.s32.totalorder %s33_s22, %s3262_s23  ;;  %p3268_p2 = scmp.lt.s32.totalorder %s3262_s23, %s3262_s23 }
   0x8   :  { %p3269_p3 = por %p3268_p2, %p3267_p1 }
   0xa   :  { %p3270_p4 = pnand %p3269_p3, %p3263_p0 }
   0xc   :  { %3273 = shalt.err (!%p3270_p4)
}
   0xd   :  { %s3363_s24 = smov 512   ;;  %s3364_s25 = smov 32  }
   0xe   :  { %38 = dma.hbm_to_vmem [thread:$0]  %s4520_s1, 1024, %s33_s22, [#allocation7], %s3363_s24, %s3363_s24, %s3364_s25  }
   0xf   :  { %s3365_s28 = smov [#allocation3]  }
  0x10   :  { %s20_s29 = sshll.u32 %s3365_s28, 4  ;;  %s21_s29 = int_to_ptr.vmem [resolvable:$true] %s20_s29 }
  0x11   :  { %s3282_s30 = scalar_lea.vmem %s21_s29, 1024  ;;  %p3287_p6 = scmp.lt.s32.totalorder %s21_s29, %s21_s29 }
  0x12   :  { %p3283_p5 = scmp.ne.s32.totalorder %s21_s29, %s3282_s30  ;;  %p3288_p7 = scmp.lt.s32.totalorder %s3282_s30, %s3282_s30 }
  0x14   :  { %p3289_p8 = por %p3288_p7, %p3287_p6 }
  0x16   :  { %p3290_p9 = pnand %p3289_p8, %p3283_p5 }
  0x18   :  { %3293 = shalt.err (!%p3290_p9)
}
  0x19   :  { %s3366_s7 = smov 128   ;;  %s3367_s8 = smov 8  }
  0x1a   :  { %26 = dma.hbm_to_vmem [thread:$0]  %s4519_s0, 1024, %s21_s29, [#allocation4], %s3366_s7, %s3366_s7, %s3367_s8  }
  0x1b   :  { %s3368_s11 = smov [#allocation8]   ;;  %s3369_s13 = smov [#allocation9]  }
  0x1c   :  { %s44_s12 = sshll.u32 %s3368_s11, 4  ;;  %s58_s1 = sshll.u32 %s3369_s13, 4  ;;  %s45_s12 = int_to_ptr.vmem [resolvable:$true] %s44_s12  ;;  %s59_s1 = int_to_ptr.vmem [resolvable:$true] %s58_s1 }
  0x1d   :  { %s3302_s14 = scalar_lea.vmem %s45_s12, 8192  ;;  %p3307_p11 = scmp.lt.s32.totalorder %s45_s12, %s45_s12 }
  0x1e   :  { %p3303_p10 = scmp.ne.s32.totalorder %s45_s12, %s3302_s14  ;;  %p3308_p12 = scmp.lt.s32.totalorder %s3302_s14, %s3302_s14 }
  0x20   :  { %p3309_p13 = por %p3308_p12, %p3307_p11 }
  0x22   :  { %p3310_p0 = pnand %p3309_p13, %p3303_p10 }
  0x24   :  { %3313 = shalt.err (!%p3310_p0)
}
  0x25   :  { %50 = dma.hbm_to_vmem [thread:$0]  %s4521_s2, 8192, %s45_s12, [#allocation7], %s3363_s24, %s3363_s24, %s3364_s25  }
  0x26   :  { %s3322_s0 = scalar_lea.vmem %s59_s1, 768  ;;  %p3327_p2 = scmp.lt.s32.totalorder %s59_s1, %s59_s1 }
  0x27   :  { %p3323_p1 = scmp.ne.s32.totalorder %s59_s1, %s3322_s0  ;;  %p3328_p3 = scmp.lt.s32.totalorder %s3322_s0, %s3322_s0 }
  0x29   :  { %p3329_p4 = por %p3328_p3, %p3327_p2 }
  0x2b   :  { %p3330_p5 = pnand %p3329_p4, %p3323_p1 }
  0x2d   :  { %3333 = shalt.err (!%p3330_p5)
}
  0x2e   :  { %s3370_s17 = smov 384   ;;  %s3371_s18 = smov 24  }
  0x2f   :  { %64 = dma.hbm_to_vmem [thread:$0]  %s4523_s4, 768, %s59_s1, [#allocation10], %s3370_s17, %s3370_s17, %s3371_s18  }
  0x30   :  { %3354 = dma.done.wait [#allocation4], 1024  }
  0x31   :  { %3355 = vsyncadd [#allocation4], 4294966272 }
  0x32   :  { %3356 = dma.done.wait [#allocation7], 9216  }
  0x33   :  { %3357 = vsyncadd [#allocation7], 4294958080 }
  0x34   :  { %3358 = dma.done.wait [#allocation10], 768  }
  0x35   :  { %3359 = vsyncadd [#allocation10], 4294966528  ;;  %v4526_v0 = vmov 0.0   ;;  %v3430_v1 = vld [vmem:[#allocation6 + $0x28] sm:$0xff]  ;;  %v3432_v2 = vld [vmem:[#allocation6 + $0x38] sm:$0xff]  ;;  %vm110_vm0 = vcmask 130048  }
  0x36   :  { %178 = vmatprep.mubr.f32.mxu0 %v4526_v0  ;;  %249 = vmatprep.mubr.f32.mxu1 %v4526_v0  ;;  %v3434_v3 = vld [vmem:[#allocation6 + $0x20] sm:$0xff]  ;;  %v3438_v4 = vld [vmem:[#allocation6 + $0x30] sm:$0xff]  ;;  %v3440_v5 = vld [vmem:[#allocation6 + $0x8] sm:$0xff]  ;;  %vm3373_vm1 = vmmov 0  }
  0x37   :  { %142 = vmatprep.subr.mxu0 %v3430_v1  ;;  %213 = vmatprep.subr.mxu1 %v3432_v2  ;;  %v3442_v6 = vld [vmem:[#allocation6 + $0x18] sm:$0xff]  ;;  %v3446_v7 = vld [vmem:[#allocation6] sm:$0xff]  ;;  %v3448_v8 = vld [vmem:[#allocation6 + $0x10] sm:$0xff] }
  0x38   :  { %143 = vmatpush1.msra.mxu0 %v3434_v3  ;;  %214 = vmatpush1.msra.mxu1 %v3438_v4  ;;  %v88_v9 = vld [vmem:[#allocation3] sm:$0xff]  ;;  %v261_v10 = vld [vmem:[#allocation3 + $0x8] sm:$0xff]  ;;  %v413_v11 = vld [vmem:[#allocation3 + $0x10] sm:$0xff] }
  0x39   :  { %144 = vmatprep.subr.mxu0 %v3440_v5  ;;  %215 = vmatprep.subr.mxu1 %v3442_v6  ;;  %v565_v12 = vld [vmem:[#allocation3 + $0x18] sm:$0xff]  ;;  %v717_v13 = vld [vmem:[#allocation3 + $0x20] sm:$0xff]  ;;  %v869_v14 = vld [vmem:[#allocation3 + $0x28] sm:$0xff] }
  0x3a   :  { %145 = vmatpush1.msra.mxu0 %v3446_v7  ;;  %216 = vmatpush1.msra.mxu1 %v3448_v8  ;;  %v1021_v15 = vld [vmem:[#allocation3 + $0x30] sm:$0xff]  ;;  %v1173_v16 = vld [vmem:[#allocation3 + $0x38] sm:$0xff]  ;;  %v1329_v17 = vld [vmem:[#allocation9 + $0x20] sm:$0xff] }
  0x3b   :  { %2983 = vmatmul.mubr.msk.f32.vlgmr.msra.gmra.mxu0 %vm110_vm0, %v88_v9  ;;  %293 = vmatprep.subr.mxu0 %v3430_v1  ;;  %v1328_v18 = vld [vmem:[#allocation9 + $0x18] sm:$0xff]  ;;  %v1330_v19 = vld [vmem:[#allocation9 + $0x28] sm:$0xff]  ;;  %v1325_v21 = vld [vmem:[#allocation9] sm:$0xff] }
  0x3c   :  { %364 = vmatprep.subr.mxu1 %v3432_v2  ;;  %2984 = vmatmul.mubr.msk.f32.vlgmr.msra.gmra.mxu1 %vm110_vm0, %v88_v9  ;;  %v1326_v20 = vld [vmem:[#allocation9 + $0x8] sm:$0xff]  ;;  %v1327_v22 = vld [vmem:[#allocation9 + $0x10] sm:$0xff]  ;;  %v3545_v24 = vld [vmem:[#allocation8 + $0x1f8] sm:$0xff] }
  0x3d   :  { %294 = vmatpush1.msra.mxu0 %v3434_v3  ;;  %365 = vmatpush1.msra.mxu1 %v3438_v4  ;;  %v3542_v23 = vld [vmem:[#allocation8 + $0x1e8] sm:$0xff]  ;;  %4627 = vst [vmem:[#allocation17_spill] sm:$0xff] %v3545_v24  ;;  %v3548_v25 = vld [vmem:[#allocation8 + $0x1e0] sm:$0xff]  ;;  %v3550_v26 = vld [vmem:[#allocation8 + $0x1f0] sm:$0xff] }
  0x3e   :  { %295 = vmatprep.subr.mxu0 %v3440_v5  ;;  %366 = vmatprep.subr.mxu1 %v3442_v6  ;;  %4626 = vst [vmem:[#allocation16_spill] sm:$0xff] %v3542_v23  ;;  %v3554_v27 = vld [vmem:[#allocation8 + $0x1c8] sm:$0xff]  ;;  %v3556_v28 = vld [vmem:[#allocation8 + $0x1d8] sm:$0xff]  ;;  %v3560_v29 = vld [vmem:[#allocation8 + $0x1c0] sm:$0xff] }
  0x3f   :  { %296 = vmatpush1.msra.mxu0 %v3446_v7  ;;  %329 = vmatprep.mubr.f32.mxu0 %v4526_v0  ;;  %v3562_v30 = vld [vmem:[#allocation8 + $0x1d0] sm:$0xff]  ;;  %v3566_v31 = vld [vmem:[#allocation8 + $0x1a8] sm:$0xff]  ;;  %v3568_v32 = vld [vmem:[#allocation8 + $0x1b8] sm:$0xff] }
  0x40   :  { %367 = vmatpush1.msra.mxu1 %v3448_v8  ;;  %2985 = vmatmul.mubr.msk.f32.vlgmr.msra.gmra.mxu0 %vm110_vm0, %v261_v10  ;;  %v3572_v33 = vld [vmem:[#allocation8 + $0x1a0] sm:$0xff]  ;;  %v3574_v34 = vld [vmem:[#allocation8 + $0x1b0] sm:$0xff]  ;;  %v3578_v35 = vld [vmem:[#allocation8 + $0x188] sm:$0xff] }
  0x41   :  { %400 = vmatprep.mubr.f32.mxu1 %v4526_v0  ;;  %445 = vmatprep.subr.mxu0 %v3430_v1  ;;  %v3580_v36 = vld [vmem:[#allocation8 + $0x198] sm:$0xff]  ;;  %v3584_v37 = vld [vmem:[#allocation8 + $0x180] sm:$0xff]  ;;  %v3586_v38 = vld [vmem:[#allocation8 + $0x190] sm:$0xff] }
  0x42   :  { %516 = vmatprep.subr.mxu1 %v3432_v2  ;;  %2986 = vmatmul.mubr.msk.f32.vlgmr.msra.gmra.mxu1 %vm110_vm0, %v261_v10  ;;  %v3590_v39 = vld [vmem:[#allocation8 + $0x168] sm:$0xff]  ;;  %v3592_v40 = vld [vmem:[#allocation8 + $0x178] sm:$0xff]  ;;  %v3596_v41 = vld [vmem:[#allocation8 + $0x160] sm:$0xff] }
  0x43   :  { %446 = vmatpush1.msra.mxu0 %v3434_v3  ;;  %517 = vmatpush1.msra.mxu1 %v3438_v4  ;;  %v3598_v42 = vld [vmem:[#allocation8 + $0x170] sm:$0xff]  ;;  %v3602_v43 = vld [vmem:[#allocation8 + $0x148] sm:$0xff]  ;;  %v3604_v44 = vld [vmem:[#allocation8 + $0x158] sm:$0xff] }
  0x44   :  { %447 = vmatprep.subr.mxu0 %v3440_v5  ;;  %518 = vmatprep.subr.mxu1 %v3442_v6  ;;  %v3608_v45 = vld [vmem:[#allocation8 + $0x140] sm:$0xff]  ;;  %v3610_v46 = vld [vmem:[#allocation8 + $0x150] sm:$0xff]  ;;  %v3614_v47 = vld [vmem:[#allocation8 + $0x128] sm:$0xff] }
  0x45   :  { %448 = vmatpush1.msra.mxu0 %v3446_v7  ;;  %481 = vmatprep.mubr.f32.mxu0 %v4526_v0  ;;  %v3616_v48 = vld [vmem:[#allocation8 + $0x138] sm:$0xff]  ;;  %v3620_v49 = vld [vmem:[#allocation8 + $0x120] sm:$0xff]  ;;  %v3622_v50 = vld [vmem:[#allocation8 + $0x130] sm:$0xff] }
  0x46   :  { %519 = vmatpush1.msra.mxu1 %v3448_v8  ;;  %2987 = vmatmul.mubr.msk.f32.vlgmr.msra.gmra.mxu0 %vm110_vm0, %v413_v11  ;;  %v3626_v51 = vld [vmem:[#allocation8 + $0x108] sm:$0xff]  ;;  %v3628_v52 = vld [vmem:[#allocation8 + $0x118] sm:$0xff]  ;;  %v3632_v53 = vld [vmem:[#allocation8 + $0x100] sm:$0xff] }
  0x47   :  { %552 = vmatprep.mubr.f32.mxu1 %v4526_v0  ;;  %597 = vmatprep.subr.mxu0 %v3430_v1  ;;  %v3634_v54 = vld [vmem:[#allocation8 + $0x110] sm:$0xff]  ;;  %v3638_v55 = vld [vmem:[#allocation8 + $0xe8] sm:$0xff]  ;;  %v3640_v56 = vld [vmem:[#allocation8 + $0xf8] sm:$0xff] }
  0x48   :  { %668 = vmatprep.subr.mxu1 %v3432_v2  ;;  %2988 = vmatmul.mubr.msk.f32.vlgmr.msra.gmra.mxu1 %vm110_vm0, %v413_v11  ;;  %v3644_v57 = vld [vmem:[#allocation8 + $0xe0] sm:$0xff]  ;;  %v3646_v58 = vld [vmem:[#allocation8 + $0xf0] sm:$0xff]  ;;  %v3650_v59 = vld [vmem:[#allocation8 + $0xc8] sm:$0xff] }
  0x49   :  { %598 = vmatpush1.msra.mxu0 %v3434_v3  ;;  %669 = vmatpush1.msra.mxu1 %v3438_v4  ;;  %v3652_v60 = vld [vmem:[#allocation8 + $0xd8] sm:$0xff]  ;;  %v3656_v61 = vld [vmem:[#allocation8 + $0xc0] sm:$0xff]  ;;  %v3658_v62 = vld [vmem:[#allocation8 + $0xd0] sm:$0xff] }
  0x4a   :  { %599 = vmatprep.subr.mxu0 %v3440_v5  ;;  %670 = vmatprep.subr.mxu1 %v3442_v6  ;;  %4628 = vst [vmem:[#allocation18_spill] sm:$0xff] %v3658_v62  ;;  %v3662_v63 = vld [vmem:[#allocation8 + $0xa8] sm:$0xff]  ;;  %v3688_v9 = vld [vmem:[#allocation8 + $0x78] sm:$0xff]  ;;  %v3692_v10 = vld [vmem:[#allocation8 + $0x60] sm:$0xff] }
  0x4b   :  { %600 = vmatpush1.msra.mxu0 %v3446_v7  ;;  %633 = vmatprep.mubr.f32.mxu0 %v4526_v0  ;;  %4629 = vst [vmem:[#allocation19_spill] sm:$0xff] %v3662_v63  ;;  %4638 = vst [vmem:[#allocation28_spill] sm:$0xff] %v3688_v9  ;;  %v3694_v11 = vld [vmem:[#allocation8 + $0x70] sm:$0xff] }
  0x4c   :  { %671 = vmatpush1.msra.mxu1 %v3448_v8  ;;  %2989 = vmatmul.mubr.msk.f32.vlgmr.msra.gmra.mxu0 %vm110_vm0, %v565_v12  ;;  %4639 = vst [vmem:[#allocation29_spill] sm:$0xff] %v3692_v10  ;;  %4640 = vst [vmem:[#allocation30_spill] sm:$0xff] %v3694_v11 }
  0x4d   :  { %704 = vmatprep.mubr.f32.mxu1 %v4526_v0  ;;  %749 = vmatprep.subr.mxu0 %v3430_v1 }
  0x4e   :  { %820 = vmatprep.subr.mxu1 %v3432_v2  ;;  %2990 = vmatmul.mubr.msk.f32.vlgmr.msra.gmra.mxu1 %vm110_vm0, %v565_v12  ;;  %v3698_v12 = vld [vmem:[#allocation8 + $0x48] sm:$0xff] }
  0x4f   :  { %750 = vmatpush1.msra.mxu0 %v3434_v3  ;;  %821 = vmatpush1.msra.mxu1 %v3438_v4  ;;  %4641 = vst [vmem:[#allocation31_spill] sm:$0xff] %v3698_v12 }
  0x50   :  { %751 = vmatprep.subr.mxu0 %v3440_v5  ;;  %822 = vmatprep.subr.mxu1 %v3442_v6 }
  0x51   :  { %752 = vmatpush1.msra.mxu0 %v3446_v7  ;;  %785 = vmatprep.mubr.f32.mxu0 %v4526_v0 }
  0x52   :  { %823 = vmatpush1.msra.mxu1 %v3448_v8  ;;  %2991 = vmatmul.mubr.msk.f32.vlgmr.msra.gmra.mxu0 %vm110_vm0, %v717_v13 }
  0x53   :  { %856 = vmatprep.mubr.f32.mxu1 %v4526_v0  ;;  %901 = vmatprep.subr.mxu0 %v3430_v1 }
  0x54   :  { %972 = vmatprep.subr.mxu1 %v3432_v2  ;;  %2992 = vmatmul.mubr.msk.f32.vlgmr.msra.gmra.mxu1 %vm110_vm0, %v717_v13  ;;  %v3700_v13 = vld [vmem:[#allocation8 + $0x58] sm:$0xff] }
  0x55   :  { %902 = vmatpush1.msra.mxu0 %v3434_v3  ;;  %973 = vmatpush1.msra.mxu1 %v3438_v4  ;;  %4642 = vst [vmem:[#allocation32_spill] sm:$0xff] %v3700_v13 }
  0x56   :  { %903 = vmatprep.subr.mxu0 %v3440_v5  ;;  %974 = vmatprep.subr.mxu1 %v3442_v6 }
  0x57   :  { %904 = vmatpush1.msra.mxu0 %v3446_v7  ;;  %937 = vmatprep.mubr.f32.mxu0 %v4526_v0 }
  0x58   :  { %975 = vmatpush1.msra.mxu1 %v3448_v8  ;;  %2993 = vmatmul.mubr.msk.f32.vlgmr.msra.gmra.mxu0 %vm110_vm0, %v869_v14 }
  0x59   :  { %1008 = vmatprep.mubr.f32.mxu1 %v4526_v0  ;;  %1053 = vmatprep.subr.mxu0 %v3430_v1 }
  0x5a   :  { %1124 = vmatprep.subr.mxu1 %v3432_v2  ;;  %2994 = vmatmul.mubr.msk.f32.vlgmr.msra.gmra.mxu1 %vm110_vm0, %v869_v14  ;;  %v3704_v14 = vld [vmem:[#allocation8 + $0x40] sm:$0xff] }
  0x5b   :  { %1054 = vmatpush1.msra.mxu0 %v3434_v3  ;;  %1125 = vmatpush1.msra.mxu1 %v3438_v4  ;;  %4643 = vst [vmem:[#allocation33_spill] sm:$0xff] %v3704_v14 }
  0x5c   :  { %1055 = vmatprep.subr.mxu0 %v3440_v5  ;;  %1126 = vmatprep.subr.mxu1 %v3442_v6 }
  0x5d   :  { %1056 = vmatpush1.msra.mxu0 %v3446_v7  ;;  %1089 = vmatprep.mubr.f32.mxu0 %v4526_v0 }
  0x5e   :  { %1127 = vmatpush1.msra.mxu1 %v3448_v8  ;;  %2995 = vmatmul.mubr.msk.f32.vlgmr.msra.gmra.mxu0 %vm110_vm0, %v1021_v15 }
  0x5f   :  { %1160 = vmatprep.mubr.f32.mxu1 %v4526_v0  ;;  %1205 = vmatprep.subr.mxu0 %v3430_v1  ;;  %v3664_v1 = vld [vmem:[#allocation8 + $0xb8] sm:$0xff] }
  0x60   :  { %1276 = vmatprep.subr.mxu1 %v3432_v2  ;;  %2996 = vmatmul.mubr.msk.f32.vlgmr.msra.gmra.mxu1 %vm110_vm0, %v1021_v15  ;;  %4630 = vst [vmem:[#allocation20_spill] sm:$0xff] %v3664_v1  ;;  %v3668_v2 = vld [vmem:[#allocation8 + $0xa0] sm:$0xff]  ;;  %v3706_v15 = vld [vmem:[#allocation8 + $0x50] sm:$0xff] }
  0x61   :  { %1206 = vmatpush1.msra.mxu0 %v3434_v3  ;;  %1277 = vmatpush1.msra.mxu1 %v3438_v4  ;;  %4631 = vst [vmem:[#allocation21_spill] sm:$0xff] %v3668_v2  ;;  %v3670_v3 = vld [vmem:[#allocation8 + $0xb0] sm:$0xff]  ;;  %v3674_v4 = vld [vmem:[#allocation8 + $0x88] sm:$0xff]  ;;  %4644 = vst [vmem:[#allocation34_spill] sm:$0xff] %v3706_v15 }
  0x62   :  { %1207 = vmatprep.subr.mxu0 %v3440_v5  ;;  %1278 = vmatprep.subr.mxu1 %v3442_v6  ;;  %4632 = vst [vmem:[#allocation22_spill] sm:$0xff] %v3670_v3  ;;  %4633 = vst [vmem:[#allocation23_spill] sm:$0xff] %v3674_v4  ;;  %v3676_v5 = vld [vmem:[#allocation8 + $0x98] sm:$0xff]  ;;  %v3680_v6 = vld [vmem:[#allocation8 + $0x80] sm:$0xff] }
  0x63   :  { %1208 = vmatpush1.msra.mxu0 %v3446_v7  ;;  %1241 = vmatprep.mubr.f32.mxu0 %v4526_v0  ;;  %4634 = vst [vmem:[#allocation24_spill] sm:$0xff] %v3676_v5  ;;  %4635 = vst [vmem:[#allocation25_spill] sm:$0xff] %v3680_v6  ;;  %v3682_v7 = vld [vmem:[#allocation8 + $0x90] sm:$0xff] }
  0x64   :  { %1279 = vmatpush1.msra.mxu1 %v3448_v8  ;;  %2997 = vmatmul.mubr.msk.f32.vlgmr.msra.gmra.mxu0 %vm110_vm0, %v1173_v16  ;;  %4636 = vst [vmem:[#allocation26_spill] sm:$0xff] %v3682_v7  ;;  %v3686_v8 = vld [vmem:[#allocation8 + $0x68] sm:$0xff] }
  0x65   :  { %1312 = vmatprep.mubr.f32.mxu1 %v4526_v0  ;;  %1379 = vmatprep.subr.mxu0 %v1329_v17  ;;  %4637 = vst [vmem:[#allocation27_spill] sm:$0xff] %v3686_v8  ;;  %v3712_v17 = vld [vmem:[#allocation8 + $0x38] sm:$0xff] }
  0x66   :  { %3030 = vmatprep.subr.mxu1 %v4526_v0  ;;  %2998 = vmatmul.mubr.msk.f32.vlgmr.msra.gmra.mxu1 %vm110_vm0, %v1173_v16  ;;  %4646 = vst [vmem:[#allocation36_spill] sm:$0xff] %v3712_v17 }
  0x67   :  { %1380 = vmatpush1.msra.mxu0 %v1328_v18  ;;  %3031 = vmatpush3.msra.mxu1 %v1330_v19  ;;  %v3716_v18 = vld [vmem:[#allocation8 + $0x20] sm:$0xff]  ;;  %v3718_v19 = vld [vmem:[#allocation8 + $0x30] sm:$0xff] }
  0x68   :  { %1381 = vmatprep.subr.mxu0 %v1326_v20  ;;  %3032 = vmatprep.subr.mxu1 %v4526_v0  ;;  %4647 = vst [vmem:[#allocation37_spill] sm:$0xff] %v3716_v18  ;;  %4648 = vst [vmem:[#allocation38_spill] sm:$0xff] %v3718_v19  ;;  %v3722_v20 = vld [vmem:[#allocation8 + $0x8] sm:$0xff] }
  0x69   :  { %1382 = vmatpush1.msra.mxu0 %v1325_v21  ;;  %1415 = vmatprep.mubr.f32.mxu0 %v4526_v0  ;;  %4649 = vst [vmem:[#allocation39_spill] sm:$0xff] %v3722_v20  ;;  %v3724_v21 = vld [vmem:[#allocation8 + $0x18] sm:$0xff] }
  0x6a   :  { %3033 = vmatpush3.msra.mxu1 %v1327_v22  ;;  %2999 = vmatmul.mubr.msk.f32.vlgmr.msra.gmra.mxu0 %vm110_vm0, %v1173_v16  ;;  %4650 = vst [vmem:[#allocation40_spill] sm:$0xff] %v3724_v21  ;;  %v3728_v22 = vld [vmem:[#allocation8] sm:$0xff] }
  0x6b   :  { %3034 = vmatprep.mubr.msk.f32.mxu1 %vm3373_vm1, %v4526_v0  ;;  %1577 = vmatprep.subr.mxu0 %v3542_v23  ;;  %4651 = vst [vmem:[#allocation41_spill] sm:$0xff] %v3728_v22  ;;  %v3732_v0 = vld [vmem:[#allocation8 + $0x10] sm:$0xff] }
  0x6c   :  { %1648 = vmatprep.subr.mxu1 %v3545_v24  ;;  %3035 = vmatmul.mubr.msk.f32.vlgmr.msra.gmra.mxu1 %vm110_vm0, %v1173_v16  ;;  %v3710_v16 = vld [vmem:[#allocation8 + $0x28] sm:$0xff]  ;;  %4652 = vst [vmem:[#allocation42_spill] sm:$0xff] %v3732_v0 }
  0x6d   :  { %1578 = vmatpush1.msra.mxu0 %v3548_v25  ;;  %1649 = vmatpush1.msra.mxu1 %v3550_v26  ;;  %4645 = vst [vmem:[#allocation35_spill] sm:$0xff] %v3710_v16 }
  0x6e   :  { %1579 = vmatprep.subr.mxu0 %v3554_v27  ;;  %1650 = vmatprep.subr.mxu1 %v3556_v28 }
  0x6f   :  { %1580 = vmatpush1.msra.mxu0 %v3560_v29  ;;  %1651 = vmatpush1.msra.mxu1 %v3562_v30 }
  0x70   :  { %1581 = vmatprep.subr.mxu0 %v3566_v31  ;;  %1652 = vmatprep.subr.mxu1 %v3568_v32 }
  0x71   :  { %1582 = vmatpush1.msra.mxu0 %v3572_v33  ;;  %1653 = vmatpush1.msra.mxu1 %v3574_v34 }
  0x72   :  { %1583 = vmatprep.subr.mxu0 %v3578_v35  ;;  %1654 = vmatprep.subr.mxu1 %v3580_v36 }
  0x73   :  { %1584 = vmatpush1.msra.mxu0 %v3584_v37  ;;  %1655 = vmatpush1.msra.mxu1 %v3586_v38 }
  0x74   :  { %1585 = vmatprep.subr.mxu0 %v3590_v39  ;;  %1656 = vmatprep.subr.mxu1 %v3592_v40 }
  0x75   :  { %1586 = vmatpush1.msra.mxu0 %v3596_v41  ;;  %1657 = vmatpush1.msra.mxu1 %v3598_v42 }
  0x76   :  { %1587 = vmatprep.subr.mxu0 %v3602_v43  ;;  %1658 = vmatprep.subr.mxu1 %v3604_v44 }
  0x77   :  { %1588 = vmatpush1.msra.mxu0 %v3608_v45  ;;  %1659 = vmatpush1.msra.mxu1 %v3610_v46 }
  0x78   :  { %1589 = vmatprep.subr.mxu0 %v3614_v47  ;;  %1660 = vmatprep.subr.mxu1 %v3616_v48 }
  0x79   :  { %1590 = vmatpush1.msra.mxu0 %v3620_v49  ;;  %1661 = vmatpush1.msra.mxu1 %v3622_v50 }
  0x7a   :  { %1591 = vmatprep.subr.mxu0 %v3626_v51  ;;  %1662 = vmatprep.subr.mxu1 %v3628_v52 }
  0x7b   :  { %1592 = vmatpush1.msra.mxu0 %v3632_v53  ;;  %1663 = vmatpush1.msra.mxu1 %v3634_v54 }
  0x7c   :  { %1593 = vmatprep.subr.mxu0 %v3638_v55  ;;  %1664 = vmatprep.subr.mxu1 %v3640_v56 }
  0x7d   :  { %1594 = vmatpush1.msra.mxu0 %v3644_v57  ;;  %1665 = vmatpush1.msra.mxu1 %v3646_v58 }
  0x7e   :  { %1595 = vmatprep.subr.mxu0 %v3650_v59  ;;  %1666 = vmatprep.subr.mxu1 %v3652_v60 }
  0x7f   :  { %1596 = vmatpush1.msra.mxu0 %v3656_v61  ;;  %1667 = vmatpush1.msra.mxu1 %v3658_v62 }
  0x80   :  { %1597 = vmatprep.subr.mxu0 %v3662_v63  ;;  %1668 = vmatprep.subr.mxu1 %v3664_v1 }
  0x81   :  { %1598 = vmatpush1.msra.mxu0 %v3668_v2  ;;  %1669 = vmatpush1.msra.mxu1 %v3670_v3 }
  0x82   :  { %1599 = vmatprep.subr.mxu0 %v3674_v4  ;;  %1670 = vmatprep.subr.mxu1 %v3676_v5 }
  0x83   :  { %1600 = vmatpush1.msra.mxu0 %v3680_v6  ;;  %1671 = vmatpush1.msra.mxu1 %v3682_v7 }
  0x84   :  { %1601 = vmatprep.subr.mxu0 %v3686_v8  ;;  %1672 = vmatprep.subr.mxu1 %v3688_v9 }
  0x85   :  { %1602 = vmatpush1.msra.mxu0 %v3692_v10  ;;  %1673 = vmatpush1.msra.mxu1 %v3694_v11 }
  0x86   :  { %1603 = vmatprep.subr.mxu0 %v3698_v12  ;;  %1674 = vmatprep.subr.mxu1 %v3700_v13 }
  0x87   :  { %1604 = vmatpush1.msra.mxu0 %v3704_v14  ;;  %1675 = vmatpush1.msra.mxu1 %v3706_v15  ;;  %v4653_v15 = vmov 0.0  }
  0x88   :  { %1605 = vmatprep.subr.mxu0 %v3710_v16  ;;  %1676 = vmatprep.subr.mxu1 %v3712_v17 }
  0x89   :  { %1606 = vmatpush1.msra.mxu0 %v3716_v18  ;;  %1677 = vmatpush1.msra.mxu1 %v3718_v19 }
  0x8a   :  { %1607 = vmatprep.subr.mxu0 %v3722_v20  ;;  %1678 = vmatprep.subr.mxu1 %v3724_v21 }
  0x8b   :  { %1608 = vmatpush1.msra.mxu0 %v3728_v22  ;;  %1641 = vmatprep.mubr.f32.mxu0 %v4653_v15 }
  0x8c   :  { %1679 = vmatpush1.msra.mxu1 %v3732_v0  ;;  %1712 = vmatprep.mubr.f32.mxu1 %v4653_v15 }
  0x8d   :  { %1642 = vmatmul.mubr.f32.vlgmr.msra.gmra.mxu0 %v4653_v15  ;;  %1713 = vmatmul.mubr.f32.vlgmr.msra.gmra.mxu1 %v4653_v15 }
  0x8e   :  { %1751 = vmatprep.subr.mxu0 %v3542_v23  ;;  %1822 = vmatprep.subr.mxu1 %v3545_v24 }
  0x8f   :  { %1752 = vmatpush1.msra.mxu0 %v3548_v25  ;;  %1823 = vmatpush1.msra.mxu1 %v3550_v26 }
  0x90   :  { %1753 = vmatprep.subr.mxu0 %v3554_v27  ;;  %1824 = vmatprep.subr.mxu1 %v3556_v28 }
  0x91   :  { %1754 = vmatpush1.msra.mxu0 %v3560_v29  ;;  %1825 = vmatpush1.msra.mxu1 %v3562_v30 }
  0x92   :  { %1755 = vmatprep.subr.mxu0 %v3566_v31  ;;  %1826 = vmatprep.subr.mxu1 %v3568_v32 }
  0x93   :  { %1756 = vmatpush1.msra.mxu0 %v3572_v33  ;;  %1827 = vmatpush1.msra.mxu1 %v3574_v34 }
  0x94   :  { %1757 = vmatprep.subr.mxu0 %v3578_v35  ;;  %1828 = vmatprep.subr.mxu1 %v3580_v36 }
  0x95   :  { %1758 = vmatpush1.msra.mxu0 %v3584_v37  ;;  %1829 = vmatpush1.msra.mxu1 %v3586_v38 }
  0x96   :  { %1759 = vmatprep.subr.mxu0 %v3590_v39  ;;  %1830 = vmatprep.subr.mxu1 %v3592_v40 }
  0x97   :  { %1760 = vmatpush1.msra.mxu0 %v3596_v41  ;;  %1831 = vmatpush1.msra.mxu1 %v3598_v42 }
  0x98   :  { %1761 = vmatprep.subr.mxu0 %v3602_v43  ;;  %1832 = vmatprep.subr.mxu1 %v3604_v44 }
  0x99   :  { %1762 = vmatpush1.msra.mxu0 %v3608_v45  ;;  %1833 = vmatpush1.msra.mxu1 %v3610_v46 }
  0x9a   :  { %1763 = vmatprep.subr.mxu0 %v3614_v47  ;;  %1834 = vmatprep.subr.mxu1 %v3616_v48 }
  0x9b   :  { %1764 = vmatpush1.msra.mxu0 %v3620_v49  ;;  %1835 = vmatpush1.msra.mxu1 %v3622_v50 }
  0x9c   :  { %1765 = vmatprep.subr.mxu0 %v3626_v51  ;;  %1836 = vmatprep.subr.mxu1 %v3628_v52 }
  0x9d   :  { %1766 = vmatpush1.msra.mxu0 %v3632_v53  ;;  %1837 = vmatpush1.msra.mxu1 %v3634_v54 }
  0x9e   :  { %1767 = vmatprep.subr.mxu0 %v3638_v55  ;;  %1838 = vmatprep.subr.mxu1 %v3640_v56 }
  0x9f   :  { %1768 = vmatpush1.msra.mxu0 %v3644_v57  ;;  %1839 = vmatpush1.msra.mxu1 %v3646_v58 }
  0xa0   :  { %1769 = vmatprep.subr.mxu0 %v3650_v59  ;;  %1840 = vmatprep.subr.mxu1 %v3652_v60 }
  0xa1   :  { %1770 = vmatpush1.msra.mxu0 %v3656_v61  ;;  %1841 = vmatpush1.msra.mxu1 %v3658_v62 }
  0xa2   :  { %1771 = vmatprep.subr.mxu0 %v3662_v63  ;;  %1842 = vmatprep.subr.mxu1 %v3664_v1 }
  0xa3   :  { %1772 = vmatpush1.msra.mxu0 %v3668_v2  ;;  %1843 = vmatpush1.msra.mxu1 %v3670_v3 }
  0xa4   :  { %1773 = vmatprep.subr.mxu0 %v3674_v4  ;;  %1844 = vmatprep.subr.mxu1 %v3676_v5  ;;  %v4654_v4 = vld [vmem:[#allocation34_spill] sm:$0xff] }
  0xa5   :  { %1774 = vmatpush1.msra.mxu0 %v3680_v6  ;;  %1845 = vmatpush1.msra.mxu1 %v3682_v7 }
  0xa6   :  { %1775 = vmatprep.subr.mxu0 %v3686_v8  ;;  %1846 = vmatprep.subr.mxu1 %v3688_v9 }
  0xa7   :  { %1776 = vmatpush1.msra.mxu0 %v3692_v10  ;;  %1847 = vmatpush1.msra.mxu1 %v3694_v11 }
  0xa8   :  { %1777 = vmatprep.subr.mxu0 %v3698_v12  ;;  %1848 = vmatprep.subr.mxu1 %v3700_v13 }
  0xa9   :  { %1778 = vmatpush1.msra.mxu0 %v3704_v14  ;;  %1849 = vmatpush1.msra.mxu1 %v4654_v4 }
  0xaa   :  { %1779 = vmatprep.subr.mxu0 %v3710_v16  ;;  %1850 = vmatprep.subr.mxu1 %v3712_v17  ;;  %v90_v17 = vlaneseq }
  0xab   :  { %1780 = vmatpush1.msra.mxu0 %v3716_v18  ;;  %1851 = vmatpush1.msra.mxu1 %v3718_v19 }
  0xac   :  { %1781 = vmatprep.subr.mxu0 %v3722_v20  ;;  %1852 = vmatprep.subr.mxu1 %v3724_v21  ;;  %v3810_v18 = vshrl.u32 %v90_v17, 7 }
  0xad   :  { %1782 = vmatpush1.msra.mxu0 %v3728_v22  ;;  %1815 = vmatprep.mubr.f32.mxu0 %v4653_v15  ;;  %v87_v22 = vld [vmem:[%s4522_s3] sm:$0xf] }
  0xae   :  { %1853 = vmatpush1.msra.mxu1 %v3732_v0  ;;  %1886 = vmatprep.mubr.f32.mxu1 %v4653_v15  ;;  %v4564_v19 = vsub.s32 0, %v3810_v18  ;;  %v4569_v0 = vsub.s32 1, %v3810_v18  ;;  %v104_v16 = vsub.s32 3, %v3810_v18 }
  0xaf   :  { %1925 = vmatprep.subr.mxu0 %v3542_v23  ;;  %1996 = vmatprep.subr.mxu1 %v3545_v24  ;;  %v4570_v23 = vsub.s32 2, %v3810_v18 }
  0xb0   :  { %v3828_v17 = vrot.slane %v87_v22, %v4564_v19  ;;  %v3833_v14 = vrot.slane %v87_v22, %v4569_v0  ;;  %v3845_v19 = vrot.slane %v87_v22, %v104_v16 }
  0xb1   :  { %v3840_v12 = vrot.slane %v87_v22, %v4570_v23 }
  0xfb   :  { %v3813_v20 = vpop.f32.mrf.mxu0 }
  0xfc   :  { %v3818_v21 = vpop.f32.mrf.mxu1 }
  0xfd   :  { %v3821_v15 = vpop.f32.mrf.mxu0 }
  0xfe   :  { %v3824_v24 = vpop.f32.mrf.mxu1 }
 0x100   :  { %v331_v4 = vpop.f32.mrf.mxu0 }
 0x101   :  { %v3836_v13 = vadd.f32 %v331_v4, %v3828_v17 }
 0x102   :  { %v333_v11 = vpop.f32.mrf.mxu0  ;;  %v402_v10 = vpop.f32.mrf.mxu1 }
 0x103   :  { %4655 = vst [vmem:[#allocation43_spill] sm:$0xff] %v3836_v13  ;;  %v3843_v9 = vadd.f32 %v333_v11, %v3833_v14  ;;  %v3848_v8 = vadd.f32 %v402_v10, %v3840_v12 }
 0x104   :  { %v404_v7 = vpop.f32.mrf.mxu1 }
 0x105   :  { %4656 = vst [vmem:[#allocation44_spill] sm:$0xff] %v3843_v9  ;;  %4657 = vst [vmem:[#allocation45_spill] sm:$0xff] %v3848_v8  ;;  %v3851_v0 = vadd.f32 %v404_v7, %v3845_v19 }
 0x106   :  { %v483_v4 = vpop.f32.mrf.mxu0 }
 0x107   :  { %4658 = vst [vmem:[#allocation46_spill] sm:$0xff] %v3851_v0  ;;  %v3854_v13 = vadd.f32 %v483_v4, %v3828_v17 }
 0x108   :  { %v485_v23 = vpop.f32.mrf.mxu0  ;;  %v554_v6 = vpop.f32.mrf.mxu1 }
 0x109   :  { %4659 = vst [vmem:[#allocation47_spill] sm:$0xff] %v3854_v13  ;;  %v3857_v5 = vadd.f32 %v485_v23, %v3833_v14  ;;  %v3860_v11 = vadd.f32 %v554_v6, %v3840_v12 }
 0x10a   :  { %v556_v16 = vpop.f32.mrf.mxu1 }
 0x10b   :  { %4660 = vst [vmem:[#allocation48_spill] sm:$0xff] %v3857_v5  ;;  %4661 = vst [vmem:[#allocation49_spill] sm:$0xff] %v3860_v11  ;;  %v3863_v10 = vadd.f32 %v556_v16, %v3845_v19 }
 0x10c   :  { %v635_v22 = vpop.f32.mrf.mxu0 }
 0x10d   :  { %4662 = vst [vmem:[#allocation50_spill] sm:$0xff] %v3863_v10  ;;  %v3866_v7 = vadd.f32 %v635_v22, %v3828_v17 }
 0x10e   :  { %v637_v8 = vpop.f32.mrf.mxu0  ;;  %v706_v0 = vpop.f32.mrf.mxu1 }
 0x10f   :  { %4663 = vst [vmem:[#allocation51_spill] sm:$0xff] %v3866_v7  ;;  %v3869_v4 = vadd.f32 %v637_v8, %v3833_v14  ;;  %v3872_v13 = vadd.f32 %v706_v0, %v3840_v12 }
 0x110   :  { %v708_v23 = vpop.f32.mrf.mxu1 }
 0x111   :  { %4664 = vst [vmem:[#allocation52_spill] sm:$0xff] %v3869_v4  ;;  %4665 = vst [vmem:[#allocation53_spill] sm:$0xff] %v3872_v13  ;;  %v3875_v6 = vadd.f32 %v708_v23, %v3845_v19 }
 0x112   :  { %v787_v11 = vpop.f32.mrf.mxu0 }
 0x113   :  { %4666 = vst [vmem:[#allocation54_spill] sm:$0xff] %v3875_v6  ;;  %v3878_v16 = vadd.f32 %v787_v11, %v3828_v17 }
 0x114   :  { %v789_v10 = vpop.f32.mrf.mxu0  ;;  %v858_v5 = vpop.f32.mrf.mxu1 }
 0x115   :  { %4667 = vst [vmem:[#allocation55_spill] sm:$0xff] %v3878_v16  ;;  %v3881_v22 = vadd.f32 %v789_v10, %v3833_v14  ;;  %v3884_v7 = vadd.f32 %v858_v5, %v3840_v12 }
 0x116   :  { %v860_v8 = vpop.f32.mrf.mxu1 }
 0x117   :  { %4668 = vst [vmem:[#allocation56_spill] sm:$0xff] %v3881_v22  ;;  %4669 = vst [vmem:[#allocation57_spill] sm:$0xff] %v3884_v7  ;;  %v3887_v0 = vadd.f32 %v860_v8, %v3845_v19 }
 0x118   :  { %v939_v13 = vpop.f32.mrf.mxu0 }
 0x119   :  { %4670 = vst [vmem:[#allocation58_spill] sm:$0xff] %v3887_v0  ;;  %v3890_v23 = vadd.f32 %v939_v13, %v3828_v17 }
 0x11a   :  { %v941_v6 = vpop.f32.mrf.mxu0  ;;  %v1010_v4 = vpop.f32.mrf.mxu1 }
 0x11b   :  { %4671 = vst [vmem:[#allocation59_spill] sm:$0xff] %v3890_v23  ;;  %v3893_v11 = vadd.f32 %v941_v6, %v3833_v14  ;;  %v3896_v16 = vadd.f32 %v1010_v4, %v3840_v12 }
 0x11c   :  { %v1012_v10 = vpop.f32.mrf.mxu1 }
 0x11d   :  { %4672 = vst [vmem:[#allocation60_spill] sm:$0xff] %v3893_v11  ;;  %4673 = vst [vmem:[#allocation61_spill] sm:$0xff] %v3896_v16  ;;  %v3899_v5 = vadd.f32 %v1012_v10, %v3845_v19  ;;  %v1331_v10 = vld [vmem:[%s4524_s5] sm:$0x7]  ;;  %s3374_s5 = smov [#allocation11]  }
 0x11e   :  { %v1091_v7 = vpop.f32.mrf.mxu0  ;;  %s2972_s22 = sshll.u32 %s3374_s5, 4  ;;  %s2973_s22 = int_to_ptr.vmem [resolvable:$true] %s2972_s22 }
 0x11f   :  { %4674 = vst [vmem:[#allocation62_spill] sm:$0xff] %v3899_v5  ;;  %v3902_v8 = vadd.f32 %v1091_v7, %v3828_v17  ;;  %s3334_s23 = scalar_lea.vmem %s2973_s22, 256  ;;  %p3339_p7 = scmp.lt.s32.totalorder %s2973_s22, %s2973_s22 }
 0x120   :  { %v1093_v0 = vpop.f32.mrf.mxu0  ;;  %v1162_v22 = vpop.f32.mrf.mxu1  ;;  %p3335_p6 = scmp.ne.s32.totalorder %s2973_s22, %s3334_s23  ;;  %p3340_p8 = scmp.lt.s32.totalorder %s3334_s23, %s3334_s23 }
 0x121   :  { %4675 = vst [vmem:[#allocation63_spill] sm:$0xff] %v3902_v8  ;;  %v3905_v13 = vadd.f32 %v1093_v0, %v3833_v14  ;;  %v3908_v23 = vadd.f32 %v1162_v22, %v3840_v12  ;;  %v4681_v22 = vsub.s32 0, %v3810_v18 }
 0x122   :  { %v1164_v6 = vpop.f32.mrf.mxu1  ;;  %p3341_p9 = por %p3340_p8, %p3339_p7 }
 0x123   :  { %4676 = vst [vmem:[#allocation64_spill] sm:$0xff] %v3905_v13  ;;  %4677 = vst [vmem:[#allocation65_spill] sm:$0xff] %v3908_v23  ;;  %v3911_v4 = vadd.f32 %v1164_v6, %v3845_v19  ;;  %v1336_v23 = vrot.slane %v1331_v10, %v4681_v22  ;;  %v4685_v22 = vsub.s32 1, %v3810_v18 }
 0x124   :  { %v1243_v16 = vpop.f32.mrf.mxu0  ;;  %p3342_p10 = pnand %p3341_p9, %p3335_p6 }
 0x125   :  { %4678 = vst [vmem:[#allocation66_spill] sm:$0xff] %v3911_v4  ;;  %v3917_v7 = vadd.f32 %v1243_v16, %v3828_v17  ;;  %v1340_v63 = vrot.slane %v1331_v10, %v4685_v22 }
 0x126   :  { %v1245_v8 = vpop.f32.mrf.mxu0  ;;  %v1314_v5 = vpop.f32.mrf.mxu1 }
 0x127   :  { %4679 = vst [vmem:[#allocation67_spill] sm:$0xff] %v3917_v7  ;;  %v3920_v0 = vadd.f32 %v1245_v8, %v3833_v14  ;;  %v3925_v13 = vadd.f32 %v1314_v5, %v3840_v12  ;;  %v4684_v7 = vsub.s32 2, %v3810_v18 }
 0x128   :  { %v1316_v6 = vpop.f32.mrf.mxu1 }
 0x129   :  { %4680 = vst [vmem:[#allocation68_spill] sm:$0xff] %v3920_v0  ;;  %4682 = vst [vmem:[#allocation69_spill] sm:$0xff] %v3925_v13  ;;  %v3928_v4 = vadd.f32 %v1316_v6, %v3845_v19  ;;  %v1344_v2 = vrot.slane %v1331_v10, %v4684_v7 }
 0x12a   :  { %v1417_v11 = vpop.f32.mrf.mxu0 }
 0x12b   :  { %4683 = vst [vmem:[#allocation70_spill] sm:$0xff] %v3928_v4  ;;  %v1418_v9 = vadd.f32 %v1417_v11, %v1336_v23 }
 0x12c   :  { %v1488_v3 = vpop.f32.mrf.mxu1  ;;  %v1419_v5 = vpop.f32.mrf.mxu0 }
 0x12d   :  { %v3001_v16 = vmul.f32 -1.442695, %v1418_v9  ;;  %v1489_v8 = vadd.f32 %v1488_v3, %v1344_v2  ;;  %v1420_v13 = vadd.f32 %v1419_v5, %v1340_v63  ;;  %v183_v3 = vadd.f32 %v3821_v15, %v3833_v14 }
 0x12e   :  { %v3036_v1 = vpop.f32.mrf.mxu1 }
 0x12f   :  { %3050 = vpow2.f32 %v3001_v16  ;;  %v3002_v0 = vmul.f32 -1.442695, %v1489_v8  ;;  %v181_v1 = vadd.f32 %v3813_v20, %v3828_v17  ;;  %v254_v8 = vadd.f32 %v3824_v24, %v3845_v19 }
 0x131   :  { %3052 = vpow2.f32 %v3002_v0 }
 0x132   :  { %3054 = vtanh.f32 %v1420_v13 }
 0x13c   :  { %v3051_v62 = vpop.eup %3050 }
 0x13d   :  { %v1495_v6 = vadd.f32 1.0, %v3051_v62 }
 0x13e   :  { %v3053_v23 = vpop.eup %3052 }
 0x13f   :  { %3056 = vrcp.f32 %v1495_v6  ;;  %v1502_v11 = vadd.f32 1.0, %v3053_v23  ;;  %v3055_v9 = vpop.eup %3054 }
 0x141   :  { %3058 = vrcp.f32 %v1502_v11 }
 0x14c   :  { %v3057_v4 = vpop.eup %3056 }
 0x14d   :  { %v1505_v7 = vmul.f32 %v3057_v4, %v3055_v9  ;;  %v1643_v2 = vpop.f32.mrf.mxu0  ;;  %v1714_v13 = vpop.f32.mrf.mxu1  ;;  %v252_v4 = vadd.f32 %v3818_v21, %v3840_v12 }
 0x14e   :  { %v1719_v18 = vadd.f32 %v1643_v2, %v181_v1  ;;  %v3059_v17 = vpop.eup %3058 }
 0x14f   :  { %3060 = vtanh.f32 %v1505_v7  ;;  %v1645_v63 = vpop.f32.mrf.mxu0  ;;  %v1716_v16 = vpop.f32.mrf.mxu1  ;;  %v1721_v14 = vadd.f32 %v1714_v13, %v252_v4  ;;  %v4687_v13 = vld [vmem:[#allocation19_spill] sm:$0xff]  ;;  %v4693_v4 = vld [vmem:[#allocation25_spill] sm:$0xff] }
 0x150   :  { %v3003_v10 = vmul.f32 -1.442695, %v1719_v18  ;;  %v1720_v62 = vadd.f32 %v1645_v63, %v183_v3  ;;  %v1722_v20 = vadd.f32 %v1716_v16, %v254_v8  ;;  %v4689_v16 = vld [vmem:[#allocation21_spill] sm:$0xff]  ;;  %v4690_v8 = vld [vmem:[#allocation22_spill] sm:$0xff] }
 0x152   :  { %3062 = vpow2.f32 %v3003_v10  ;;  %v3004_v0 = vmul.f32 -1.442695, %v1720_v62  ;;  %v3005_v15 = vmul.f32 -1.442695, %v1722_v20  ;;  %v4686_v62 = vld [vmem:[#allocation18_spill] sm:$0xff]  ;;  %v4691_v20 = vld [vmem:[#allocation23_spill] sm:$0xff] }
 0x154   :  { %3064 = vpow2.f32 %v3004_v0  ;;  %v4688_v0 = vld [vmem:[#allocation20_spill] sm:$0xff] }
 0x155   :  { %3066 = vtanh.f32 %v1721_v14  ;;  %v4695_v14 = vld [vmem:[#allocation27_spill] sm:$0xff] }
 0x156   :  { %3068 = vpow2.f32 %v3005_v15  ;;  %v4696_v15 = vld [vmem:[#allocation28_spill] sm:$0xff] }
 0x15c   :  { %v3061_v22 = vpop.eup %3060 }
 0x15d   :  { %v1507_v5 = vmul.f32 %v3061_v22, %v3059_v17  ;;  %v4692_v17 = vld [vmem:[#allocation24_spill] sm:$0xff]  ;;  %v4694_v22 = vld [vmem:[#allocation26_spill] sm:$0xff] }
 0x15f   :  { %v3063_v6 = vpop.eup %3062  ;;  %1508 = vst [vmem:[#allocation11 + $0x8] sm:$0xff] %v1507_v5  ;;  %v4697_v5 = vld [vmem:[#allocation29_spill] sm:$0xff] }
 0x160   :  { %v1726_v23 = vadd.f32 1.0, %v3063_v6  ;;  %v4698_v6 = vld [vmem:[#allocation30_spill] sm:$0xff] }
 0x161   :  { %v3065_v11 = vpop.eup %3064 }
 0x162   :  { %3070 = vrcp.f32 %v1726_v23  ;;  %v1732_v9 = vadd.f32 1.0, %v3065_v11  ;;  %v3067_v1 = vpop.eup %3066  ;;  %v4699_v23 = vld [vmem:[#allocation31_spill] sm:$0xff]  ;;  %v4700_v11 = vld [vmem:[#allocation32_spill] sm:$0xff] }
 0x163   :  { %v3069_v24 = vpop.eup %3068 }
 0x164   :  { %3072 = vrcp.f32 %v1732_v9  ;;  %v1739_v3 = vadd.f32 1.0, %v3069_v24  ;;  %v4701_v9 = vld [vmem:[#allocation33_spill] sm:$0xff]  ;;  %v4703_v24 = vld [vmem:[#allocation35_spill] sm:$0xff] }
 0x166   :  { %3074 = vrcp.f32 %v1739_v3  ;;  %v4707_v3 = vld [vmem:[#allocation39_spill] sm:$0xff] }
 0x16f   :  { %v3071_v19 = vpop.eup %3070 }
 0x170   :  { %v1743_v7 = vmul.f32 %v3071_v19, %v3067_v1  ;;  %v4702_v1 = vld [vmem:[#allocation34_spill] sm:$0xff]  ;;  %v4704_v19 = vld [vmem:[#allocation36_spill] sm:$0xff] }
 0x171   :  { %v3073_v2 = vpop.eup %3072 }
 0x172   :  { %v1742_v12 = vmul.f32 0.0, %v3073_v2  ;;  %v4706_v2 = vld [vmem:[#allocation38_spill] sm:$0xff] }
 0x173   :  { %v3075_v18 = vpop.eup %3074 }
 0x174   :  { %v3942_v21 = vadd.f32 %v1743_v7, %v1742_v12  ;;  %v4705_v7 = vld [vmem:[#allocation37_spill] sm:$0xff]  ;;  %v4708_v12 = vld [vmem:[#allocation40_spill] sm:$0xff] }
 0x176   :  { %3076 = vtanh.f32 %v3942_v21 }
 0x183   :  { %v3077_v63 = vpop.eup %3076 }
 0x184   :  { %v1746_v10 = vmul.f32 %v3077_v63, %v3075_v18  ;;  %v4709_v18 = vld [vmem:[#allocation41_spill] sm:$0xff]  ;;  %v4710_v63 = vmov 0.0  }
 0x186   :  { %1816 = vmatmul.mubr.f32.vlgmr.msra.gmra.mxu0 %v1746_v10  ;;  %1887 = vmatmul.mubr.f32.vlgmr.msra.gmra.mxu1 %v1746_v10  ;;  %v4711_v10 = vld [vmem:[#allocation42_spill] sm:$0xff] }
 0x187   :  { %1926 = vmatpush1.msra.mxu0 %v3548_v25  ;;  %1997 = vmatpush1.msra.mxu1 %v3550_v26 }
 0x188   :  { %1927 = vmatprep.subr.mxu0 %v3554_v27  ;;  %1998 = vmatprep.subr.mxu1 %v3556_v28 }
 0x189   :  { %1928 = vmatpush1.msra.mxu0 %v3560_v29  ;;  %1999 = vmatpush1.msra.mxu1 %v3562_v30 }
 0x18a   :  { %1929 = vmatprep.subr.mxu0 %v3566_v31  ;;  %2000 = vmatprep.subr.mxu1 %v3568_v32 }
 0x18b   :  { %1930 = vmatpush1.msra.mxu0 %v3572_v33  ;;  %2001 = vmatpush1.msra.mxu1 %v3574_v34 }
 0x18c   :  { %1931 = vmatprep.subr.mxu0 %v3578_v35  ;;  %2002 = vmatprep.subr.mxu1 %v3580_v36 }
 0x18d   :  { %1932 = vmatpush1.msra.mxu0 %v3584_v37  ;;  %2003 = vmatpush1.msra.mxu1 %v3586_v38 }
 0x18e   :  { %1933 = vmatprep.subr.mxu0 %v3590_v39  ;;  %2004 = vmatprep.subr.mxu1 %v3592_v40 }
 0x18f   :  { %1934 = vmatpush1.msra.mxu0 %v3596_v41  ;;  %2005 = vmatpush1.msra.mxu1 %v3598_v42 }
 0x190   :  { %1935 = vmatprep.subr.mxu0 %v3602_v43  ;;  %2006 = vmatprep.subr.mxu1 %v3604_v44 }
 0x191   :  { %1936 = vmatpush1.msra.mxu0 %v3608_v45  ;;  %2007 = vmatpush1.msra.mxu1 %v3610_v46 }
 0x192   :  { %1937 = vmatprep.subr.mxu0 %v3614_v47  ;;  %2008 = vmatprep.subr.mxu1 %v3616_v48 }
 0x193   :  { %1938 = vmatpush1.msra.mxu0 %v3620_v49  ;;  %2009 = vmatpush1.msra.mxu1 %v3622_v50 }
 0x194   :  { %1939 = vmatprep.subr.mxu0 %v3626_v51  ;;  %2010 = vmatprep.subr.mxu1 %v3628_v52 }
 0x195   :  { %1940 = vmatpush1.msra.mxu0 %v3632_v53  ;;  %2011 = vmatpush1.msra.mxu1 %v3634_v54 }
 0x196   :  { %1941 = vmatprep.subr.mxu0 %v3638_v55  ;;  %2012 = vmatprep.subr.mxu1 %v3640_v56 }
 0x197   :  { %1942 = vmatpush1.msra.mxu0 %v3644_v57  ;;  %2013 = vmatpush1.msra.mxu1 %v3646_v58 }
 0x198   :  { %1943 = vmatprep.subr.mxu0 %v3650_v59  ;;  %2014 = vmatprep.subr.mxu1 %v3652_v60 }
 0x199   :  { %1944 = vmatpush1.msra.mxu0 %v3656_v61  ;;  %2015 = vmatpush1.msra.mxu1 %v4686_v62 }
 0x19a   :  { %1945 = vmatprep.subr.mxu0 %v4687_v13  ;;  %2016 = vmatprep.subr.mxu1 %v4688_v0 }
 0x19b   :  { %1946 = vmatpush1.msra.mxu0 %v4689_v16  ;;  %2017 = vmatpush1.msra.mxu1 %v4690_v8 }
 0x19c   :  { %1947 = vmatprep.subr.mxu0 %v4691_v20  ;;  %2018 = vmatprep.subr.mxu1 %v4692_v17 }
 0x19d   :  { %1948 = vmatpush1.msra.mxu0 %v4693_v4  ;;  %2019 = vmatpush1.msra.mxu1 %v4694_v22 }
 0x19e   :  { %1949 = vmatprep.subr.mxu0 %v4695_v14  ;;  %2020 = vmatprep.subr.mxu1 %v4696_v15  ;;  %v4717_v15 = vld [vmem:[#allocation45_spill] sm:$0xff] }
 0x19f   :  { %1950 = vmatpush1.msra.mxu0 %v4697_v5  ;;  %2021 = vmatpush1.msra.mxu1 %v4698_v6  ;;  %v4716_v5 = vld [vmem:[#allocation46_spill] sm:$0xff] }
 0x1a0   :  { %1951 = vmatprep.subr.mxu0 %v4699_v23  ;;  %2022 = vmatprep.subr.mxu1 %v4700_v11 }
 0x1a1   :  { %1952 = vmatpush1.msra.mxu0 %v4701_v9  ;;  %2023 = vmatpush1.msra.mxu1 %v4702_v1  ;;  %v4712_v1 = vld [vmem:[#allocation16_spill] sm:$0xff] }
 0x1a2   :  { %1953 = vmatprep.subr.mxu0 %v4703_v24  ;;  %2024 = vmatprep.subr.mxu1 %v4704_v19  ;;  %v4713_v24 = vld [vmem:[#allocation17_spill] sm:$0xff] }
 0x1a3   :  { %1954 = vmatpush1.msra.mxu0 %v4705_v7  ;;  %2025 = vmatpush1.msra.mxu1 %v4706_v2  ;;  %v4714_v7 = vld [vmem:[#allocation43_spill] sm:$0xff] }
 0x1a4   :  { %1955 = vmatprep.subr.mxu0 %v4707_v3  ;;  %2026 = vmatprep.subr.mxu1 %v4708_v12  ;;  %v4715_v3 = vld [vmem:[#allocation44_spill] sm:$0xff] }
 0x1a5   :  { %1956 = vmatpush1.msra.mxu0 %v4709_v18  ;;  %1989 = vmatprep.mubr.f32.mxu0 %v4710_v63 }
 0x1a6   :  { %2027 = vmatpush1.msra.mxu1 %v4711_v10  ;;  %2060 = vmatprep.mubr.f32.mxu1 %v4710_v63 }
 0x1a7   :  { %2099 = vmatprep.subr.mxu0 %v4712_v1  ;;  %2170 = vmatprep.subr.mxu1 %v4713_v24 }
 0x246   :  { %v1817_v19 = vpop.f32.mrf.mxu0  ;;  %v1888_v12 = vpop.f32.mrf.mxu1 }
 0x247   :  { %v1893_v9 = vadd.f32 %v1817_v19, %v4714_v7  ;;  %v1895_v63 = vadd.f32 %v1888_v12, %v4717_v15 }
 0x248   :  { %v1819_v2 = vpop.f32.mrf.mxu0  ;;  %v1890_v6 = vpop.f32.mrf.mxu1 }
 0x249   :  { %v3006_v11 = vmul.f32 -1.442695, %v1893_v9  ;;  %v1894_v23 = vadd.f32 %v1819_v2, %v4715_v3  ;;  %v1896_v10 = vadd.f32 %v1890_v6, %v4716_v5 }
 0x24b   :  { %3078 = vpow2.f32 %v3006_v11  ;;  %v3007_v18 = vmul.f32 -1.442695, %v1894_v23  ;;  %v3008_v14 = vmul.f32 -1.442695, %v1896_v10 }
 0x24d   :  { %3080 = vpow2.f32 %v3007_v18 }
 0x24e   :  { %3082 = vtanh.f32 %v1895_v63 }
 0x24f   :  { %3084 = vpow2.f32 %v3008_v14 }
 0x258   :  { %v3079_v1 = vpop.eup %3078 }
 0x259   :  { %v1900_v22 = vadd.f32 1.0, %v3079_v1 }
 0x25a   :  { %v3081_v24 = vpop.eup %3080 }
 0x25b   :  { %3086 = vrcp.f32 %v1900_v22  ;;  %v1906_v19 = vadd.f32 1.0, %v3081_v24  ;;  %v3083_v9 = vpop.eup %3082 }
 0x25c   :  { %v3085_v7 = vpop.eup %3084 }
 0x25d   :  { %3088 = vrcp.f32 %v1906_v19  ;;  %v1913_v3 = vadd.f32 1.0, %v3085_v7 }
 0x25f   :  { %3090 = vrcp.f32 %v1913_v3 }
 0x268   :  { %v3087_v11 = vpop.eup %3086 }
 0x269   :  { %v1917_v2 = vmul.f32 %v3087_v11, %v3083_v9 }
 0x26a   :  { %v3089_v23 = vpop.eup %3088 }
 0x26b   :  { %v1916_v18 = vmul.f32 %v3089_v23, %v3942_v21 }
 0x26c   :  { %v3091_v15 = vpop.eup %3090 }
 0x26d   :  { %v4016_v5 = vadd.f32 %v1917_v2, %v1916_v18 }
 0x26f   :  { %3092 = vtanh.f32 %v4016_v5 }
 0x27c   :  { %v3093_v6 = vpop.eup %3092 }
 0x27d   :  { %v1920_v12 = vmul.f32 %v3093_v6, %v3091_v15  ;;  %v4095_v6 = vld [vmem:[#allocation8 + $0x1e0] sm:$0xff] }
 0x27f   :  { %1990 = vmatmul.mubr.f32.vlgmr.msra.gmra.mxu0 %v1920_v12  ;;  %2061 = vmatmul.mubr.f32.vlgmr.msra.gmra.mxu1 %v1920_v12  ;;  %v4098_v12 = vld [vmem:[#allocation8 + $0x1f0] sm:$0xff] }
 0x280   :  { %2100 = vmatpush1.msra.mxu0 %v3548_v25  ;;  %2171 = vmatpush1.msra.mxu1 %v3550_v26  ;;  %v4718_v25 = vld [vmem:[#allocation26_spill] sm:$0xff]  ;;  %v4719_v26 = vld [vmem:[#allocation27_spill] sm:$0xff] }
 0x281   :  { %2101 = vmatprep.subr.mxu0 %v3554_v27  ;;  %2172 = vmatprep.subr.mxu1 %v3556_v28  ;;  %v4720_v27 = vld [vmem:[#allocation28_spill] sm:$0xff]  ;;  %v4721_v28 = vld [vmem:[#allocation29_spill] sm:$0xff] }
 0x282   :  { %2102 = vmatpush1.msra.mxu0 %v3560_v29  ;;  %2173 = vmatpush1.msra.mxu1 %v3562_v30  ;;  %v4722_v29 = vld [vmem:[#allocation30_spill] sm:$0xff]  ;;  %v4723_v30 = vld [vmem:[#allocation31_spill] sm:$0xff] }
 0x283   :  { %2103 = vmatprep.subr.mxu0 %v3566_v31  ;;  %2174 = vmatprep.subr.mxu1 %v3568_v32  ;;  %v4724_v31 = vld [vmem:[#allocation32_spill] sm:$0xff]  ;;  %v4725_v32 = vld [vmem:[#allocation33_spill] sm:$0xff] }
 0x284   :  { %2104 = vmatpush1.msra.mxu0 %v3572_v33  ;;  %2175 = vmatpush1.msra.mxu1 %v3574_v34  ;;  %v4726_v33 = vld [vmem:[#allocation34_spill] sm:$0xff]  ;;  %v4727_v34 = vld [vmem:[#allocation35_spill] sm:$0xff] }
 0x285   :  { %2105 = vmatprep.subr.mxu0 %v3578_v35  ;;  %2176 = vmatprep.subr.mxu1 %v3580_v36  ;;  %v4728_v35 = vld [vmem:[#allocation36_spill] sm:$0xff]  ;;  %v4729_v36 = vld [vmem:[#allocation37_spill] sm:$0xff] }
 0x286   :  { %2106 = vmatpush1.msra.mxu0 %v3584_v37  ;;  %2177 = vmatpush1.msra.mxu1 %v3586_v38  ;;  %v4730_v37 = vld [vmem:[#allocation38_spill] sm:$0xff]  ;;  %v4731_v38 = vld [vmem:[#allocation39_spill] sm:$0xff] }
 0x287   :  { %2107 = vmatprep.subr.mxu0 %v3590_v39  ;;  %2178 = vmatprep.subr.mxu1 %v3592_v40  ;;  %v4732_v39 = vld [vmem:[#allocation40_spill] sm:$0xff]  ;;  %v4733_v40 = vld [vmem:[#allocation41_spill] sm:$0xff] }
 0x288   :  { %2108 = vmatpush1.msra.mxu0 %v3596_v41  ;;  %2179 = vmatpush1.msra.mxu1 %v3598_v42  ;;  %v4734_v41 = vmov 0.0   ;;  %v4735_v42 = vld [vmem:[#allocation42_spill] sm:$0xff] }
 0x289   :  { %2109 = vmatprep.subr.mxu0 %v3602_v43  ;;  %2180 = vmatprep.subr.mxu1 %v3604_v44  ;;  %v4083_v43 = vld [vmem:[#allocation8 + $0x1e8] sm:$0xff] }
 0x28a   :  { %2110 = vmatpush1.msra.mxu0 %v3608_v45  ;;  %2181 = vmatpush1.msra.mxu1 %v3610_v46  ;;  %4736 = vst [vmem:[#allocation18_spill] sm:$0xff] %v4083_v43  ;;  %v4737_v44 = vld [vmem:[#allocation17_spill] sm:$0xff]  ;;  %v4738_v46 = vld [vmem:[#allocation47_spill] sm:$0xff] }
 0x28b   :  { %2111 = vmatprep.subr.mxu0 %v3614_v47  ;;  %2182 = vmatprep.subr.mxu1 %v3616_v48 }
 0x28c   :  { %2112 = vmatpush1.msra.mxu0 %v3620_v49  ;;  %2183 = vmatpush1.msra.mxu1 %v3622_v50  ;;  %v4739_v50 = vld [vmem:[#allocation48_spill] sm:$0xff] }
 0x28d   :  { %2113 = vmatprep.subr.mxu0 %v3626_v51  ;;  %2184 = vmatprep.subr.mxu1 %v3628_v52 }
 0x28e   :  { %2114 = vmatpush1.msra.mxu0 %v3632_v53  ;;  %2185 = vmatpush1.msra.mxu1 %v3634_v54 }
 0x28f   :  { %2115 = vmatprep.subr.mxu0 %v3638_v55  ;;  %2186 = vmatprep.subr.mxu1 %v3640_v56  ;;  %v4740_v55 = vld [vmem:[#allocation50_spill] sm:$0xff] }
 0x290   :  { %2116 = vmatpush1.msra.mxu0 %v3644_v57  ;;  %2187 = vmatpush1.msra.mxu1 %v3646_v58  ;;  %v4741_v57 = vld [vmem:[#allocation49_spill] sm:$0xff] }
 0x291   :  { %2117 = vmatprep.subr.mxu0 %v3650_v59  ;;  %2188 = vmatprep.subr.mxu1 %v3652_v60 }
 0x292   :  { %2118 = vmatpush1.msra.mxu0 %v3656_v61  ;;  %2189 = vmatpush1.msra.mxu1 %v4686_v62 }
 0x293   :  { %2119 = vmatprep.subr.mxu0 %v4687_v13  ;;  %2190 = vmatprep.subr.mxu1 %v4688_v0 }
 0x294   :  { %2120 = vmatpush1.msra.mxu0 %v4689_v16  ;;  %2191 = vmatpush1.msra.mxu1 %v4690_v8 }
 0x295   :  { %2121 = vmatprep.subr.mxu0 %v4691_v20  ;;  %2192 = vmatprep.subr.mxu1 %v4692_v17 }
 0x296   :  { %2122 = vmatpush1.msra.mxu0 %v4693_v4  ;;  %2193 = vmatpush1.msra.mxu1 %v4718_v25 }
 0x297   :  { %2123 = vmatprep.subr.mxu0 %v4719_v26  ;;  %2194 = vmatprep.subr.mxu1 %v4720_v27 }
 0x298   :  { %2124 = vmatpush1.msra.mxu0 %v4721_v28  ;;  %2195 = vmatpush1.msra.mxu1 %v4722_v29 }
 0x299   :  { %2125 = vmatprep.subr.mxu0 %v4723_v30  ;;  %2196 = vmatprep.subr.mxu1 %v4724_v31 }
 0x29a   :  { %2126 = vmatpush1.msra.mxu0 %v4725_v32  ;;  %2197 = vmatpush1.msra.mxu1 %v4726_v33 }
 0x29b   :  { %2127 = vmatprep.subr.mxu0 %v4727_v34  ;;  %2198 = vmatprep.subr.mxu1 %v4728_v35 }
 0x29c   :  { %2128 = vmatpush1.msra.mxu0 %v4729_v36  ;;  %2199 = vmatpush1.msra.mxu1 %v4730_v37 }
 0x29d   :  { %2129 = vmatprep.subr.mxu0 %v4731_v38  ;;  %2200 = vmatprep.subr.mxu1 %v4732_v39 }
 0x29e   :  { %2130 = vmatpush1.msra.mxu0 %v4733_v40  ;;  %2163 = vmatprep.mubr.f32.mxu0 %v4734_v41 }
 0x29f   :  { %2201 = vmatpush1.msra.mxu1 %v4735_v42  ;;  %2234 = vmatprep.mubr.f32.mxu1 %v4734_v41 }
 0x2a0   :  { %2273 = vmatprep.subr.mxu0 %v4083_v43  ;;  %2344 = vmatprep.subr.mxu1 %v4737_v44  ;;  %v4101_v44 = vld [vmem:[#allocation8 + $0x1c8] sm:$0xff] }
 0x33f   :  { %v1991_v45 = vpop.f32.mrf.mxu0  ;;  %v2062_v52 = vpop.f32.mrf.mxu1 }
 0x340   :  { %v2067_v47 = vadd.f32 %v1991_v45, %v4738_v46  ;;  %v2069_v58 = vadd.f32 %v2062_v52, %v4741_v57  ;;  %v4107_v45 = vld [vmem:[#allocation8 + $0x1c0] sm:$0xff]  ;;  %v4110_v46 = vld [vmem:[#allocation8 + $0x1d0] sm:$0xff]  ;;  %v4128_v52 = vld [vmem:[#allocation8 + $0x198] sm:$0xff] }
 0x341   :  { %v1993_v48 = vpop.f32.mrf.mxu0  ;;  %v2064_v54 = vpop.f32.mrf.mxu1  ;;  %v4143_v57 = vld [vmem:[#allocation8 + $0x160] sm:$0xff] }
 0x342   :  { %v3009_v49 = vmul.f32 -1.442695, %v2067_v47  ;;  %v2068_v51 = vadd.f32 %v1993_v48, %v4739_v50  ;;  %v2070_v56 = vadd.f32 %v2064_v54, %v4740_v55  ;;  %v4113_v47 = vld [vmem:[#allocation8 + $0x1a8] sm:$0xff]  ;;  %v4116_v48 = vld [vmem:[#allocation8 + $0x1b8] sm:$0xff]  ;;  %v4122_v50 = vld [vmem:[#allocation8 + $0x1b0] sm:$0xff] }
 0x343   :  { %v4134_v54 = vld [vmem:[#allocation8 + $0x190] sm:$0xff]  ;;  %v4137_v55 = vld [vmem:[#allocation8 + $0x168] sm:$0xff] }
 0x344   :  { %3094 = vpow2.f32 %v3009_v49  ;;  %v3010_v53 = vmul.f32 -1.442695, %v2068_v51  ;;  %v3011_v21 = vmul.f32 -1.442695, %v2070_v56  ;;  %v4119_v49 = vld [vmem:[#allocation8 + $0x1a0] sm:$0xff]  ;;  %v4125_v51 = vld [vmem:[#allocation8 + $0x188] sm:$0xff] }
 0x345   :  { %v4140_v56 = vld [vmem:[#allocation8 + $0x178] sm:$0xff] }
 0x346   :  { %3096 = vpow2.f32 %v3010_v53  ;;  %v4131_v53 = vld [vmem:[#allocation8 + $0x180] sm:$0xff] }
 0x347   :  { %3098 = vtanh.f32 %v2069_v58  ;;  %v4146_v58 = vld [vmem:[#allocation8 + $0x170] sm:$0xff] }
 0x348   :  { %3100 = vpow2.f32 %v3011_v21  ;;  %v4149_v21 = vld [vmem:[#allocation8 + $0x148] sm:$0xff] }
 0x351   :  { %v3095_v22 = vpop.eup %3094 }
 0x352   :  { %v2074_v14 = vadd.f32 1.0, %v3095_v22  ;;  %v4152_v22 = vld [vmem:[#allocation8 + $0x158] sm:$0xff] }
 0x353   :  { %v3097_v24 = vpop.eup %3096 }
 0x354   :  { %3102 = vrcp.f32 %v2074_v14  ;;  %v2080_v63 = vadd.f32 1.0, %v3097_v24  ;;  %v3099_v10 = vpop.eup %3098  ;;  %v4155_v14 = vld [vmem:[#allocation8 + $0x140] sm:$0xff]  ;;  %v4158_v24 = vld [vmem:[#allocation8 + $0x150] sm:$0xff] }
 0x355   :  { %v3101_v1 = vpop.eup %3100 }
 0x356   :  { %3104 = vrcp.f32 %v2080_v63  ;;  %v2087_v11 = vadd.f32 1.0, %v3101_v1  ;;  %v4161_v63 = vld [vmem:[#allocation8 + $0x128] sm:$0xff]  ;;  %v4167_v1 = vld [vmem:[#allocation8 + $0x120] sm:$0xff] }
 0x358   :  { %3106 = vrcp.f32 %v2087_v11  ;;  %v4179_v11 = vld [vmem:[#allocation8 + $0x100] sm:$0xff] }
 0x361   :  { %v3103_v19 = vpop.eup %3102 }
 0x362   :  { %v2091_v9 = vmul.f32 %v3103_v19, %v3099_v10  ;;  %v4164_v10 = vld [vmem:[#allocation8 + $0x138] sm:$0xff]  ;;  %v4170_v19 = vld [vmem:[#allocation8 + $0x130] sm:$0xff] }
 0x363   :  { %v3105_v7 = vpop.eup %3104 }
 0x364   :  { %v2090_v2 = vmul.f32 %v3105_v7, %v4016_v5  ;;  %v4104_v5 = vld [vmem:[#allocation8 + $0x1d8] sm:$0xff] }
 0x365   :  { %v3107_v3 = vpop.eup %3106  ;;  %v4176_v7 = vld [vmem:[#allocation8 + $0x118] sm:$0xff] }
 0x366   :  { %v4092_v23 = vadd.f32 %v2091_v9, %v2090_v2  ;;  %v4173_v9 = vld [vmem:[#allocation8 + $0x108] sm:$0xff]  ;;  %4742 = vst [vmem:[#allocation19_spill] sm:$0xff] %v4176_v7  ;;  %v4182_v2 = vld [vmem:[#allocation8 + $0x110] sm:$0xff] }
 0x368   :  { %3108 = vtanh.f32 %v4092_v23 }
 0x375   :  { %v3109_v18 = vpop.eup %3108 }
 0x376   :  { %v2094_v15 = vmul.f32 %v3109_v18, %v3107_v3  ;;  %v4185_v3 = vld [vmem:[#allocation8 + $0xe8] sm:$0xff]  ;;  %v4188_v18 = vld [vmem:[#allocation8 + $0xf8] sm:$0xff] }
 0x378   :  { %2164 = vmatmul.mubr.f32.vlgmr.msra.gmra.mxu0 %v2094_v15  ;;  %2235 = vmatmul.mubr.f32.vlgmr.msra.gmra.mxu1 %v2094_v15  ;;  %v4191_v15 = vld [vmem:[#allocation8 + $0xe0] sm:$0xff] }
 0x379   :  { %2274 = vmatpush1.msra.mxu0 %v4095_v6  ;;  %2345 = vmatpush1.msra.mxu1 %v4098_v12 }
 0x37a   :  { %2275 = vmatprep.subr.mxu0 %v4101_v44  ;;  %2346 = vmatprep.subr.mxu1 %v4104_v5 }
 0x37b   :  { %2276 = vmatpush1.msra.mxu0 %v4107_v45  ;;  %2347 = vmatpush1.msra.mxu1 %v4110_v46 }
 0x37c   :  { %2277 = vmatprep.subr.mxu0 %v4113_v47  ;;  %2348 = vmatprep.subr.mxu1 %v4116_v48 }
 0x37d   :  { %2278 = vmatpush1.msra.mxu0 %v4119_v49  ;;  %2349 = vmatpush1.msra.mxu1 %v4122_v50 }
 0x37e   :  { %2279 = vmatprep.subr.mxu0 %v4125_v51  ;;  %2350 = vmatprep.subr.mxu1 %v4128_v52 }
 0x37f   :  { %2280 = vmatpush1.msra.mxu0 %v4131_v53  ;;  %2351 = vmatpush1.msra.mxu1 %v4134_v54 }
 0x380   :  { %2281 = vmatprep.subr.mxu0 %v4137_v55  ;;  %2352 = vmatprep.subr.mxu1 %v4140_v56 }
 0x381   :  { %2282 = vmatpush1.msra.mxu0 %v4143_v57  ;;  %2353 = vmatpush1.msra.mxu1 %v4146_v58 }
 0x382   :  { %2283 = vmatprep.subr.mxu0 %v4149_v21  ;;  %2354 = vmatprep.subr.mxu1 %v4152_v22 }
 0x383   :  { %2284 = vmatpush1.msra.mxu0 %v4155_v14  ;;  %2355 = vmatpush1.msra.mxu1 %v4158_v24 }
 0x384   :  { %2285 = vmatprep.subr.mxu0 %v4161_v63  ;;  %2356 = vmatprep.subr.mxu1 %v4164_v10 }
 0x385   :  { %2286 = vmatpush1.msra.mxu0 %v4167_v1  ;;  %2357 = vmatpush1.msra.mxu1 %v4170_v19 }
 0x386   :  { %2287 = vmatprep.subr.mxu0 %v4173_v9  ;;  %2358 = vmatprep.subr.mxu1 %v4176_v7  ;;  %v4194_v7 = vld [vmem:[#allocation8 + $0xf0] sm:$0xff] }
 0x387   :  { %2288 = vmatpush1.msra.mxu0 %v4179_v11  ;;  %2359 = vmatpush1.msra.mxu1 %v4182_v2 }
 0x388   :  { %2289 = vmatprep.subr.mxu0 %v4185_v3  ;;  %2360 = vmatprep.subr.mxu1 %v4188_v18 }
 0x389   :  { %2290 = vmatpush1.msra.mxu0 %v4191_v15  ;;  %2361 = vmatpush1.msra.mxu1 %v4194_v7 }
 0x38a   :  { %2291 = vmatprep.subr.mxu0 %v3650_v59  ;;  %2362 = vmatprep.subr.mxu1 %v3652_v60  ;;  %v4228_v59 = vld [vmem:[#allocation8 + $0x1f8] sm:$0xff] }
 0x38b   :  { %2292 = vmatpush1.msra.mxu0 %v3656_v61  ;;  %2363 = vmatpush1.msra.mxu1 %v4686_v62  ;;  %4743 = vst [vmem:[#allocation20_spill] sm:$0xff] %v4228_v59  ;;  %v4744_v61 = vld [vmem:[#allocation51_spill] sm:$0xff] }
 0x38c   :  { %2293 = vmatprep.subr.mxu0 %v4687_v13  ;;  %2364 = vmatprep.subr.mxu1 %v4688_v0 }
 0x38d   :  { %2294 = vmatpush1.msra.mxu0 %v4689_v16  ;;  %2365 = vmatpush1.msra.mxu1 %v4690_v8  ;;  %v4745_v16 = vld [vmem:[#allocation52_spill] sm:$0xff] }
 0x38e   :  { %2295 = vmatprep.subr.mxu0 %v4691_v20  ;;  %2366 = vmatprep.subr.mxu1 %v4692_v17 }
 0x38f   :  { %2296 = vmatpush1.msra.mxu0 %v4693_v4  ;;  %2367 = vmatpush1.msra.mxu1 %v4718_v25  ;;  %v4746_v25 = vld [vmem:[#allocation54_spill] sm:$0xff] }
 0x390   :  { %2297 = vmatprep.subr.mxu0 %v4719_v26  ;;  %2368 = vmatprep.subr.mxu1 %v4720_v27  ;;  %v4747_v27 = vld [vmem:[#allocation53_spill] sm:$0xff] }
 0x391   :  { %2298 = vmatpush1.msra.mxu0 %v4721_v28  ;;  %2369 = vmatpush1.msra.mxu1 %v4722_v29 }
 0x392   :  { %2299 = vmatprep.subr.mxu0 %v4723_v30  ;;  %2370 = vmatprep.subr.mxu1 %v4724_v31 }
 0x393   :  { %2300 = vmatpush1.msra.mxu0 %v4725_v32  ;;  %2371 = vmatpush1.msra.mxu1 %v4726_v33 }
 0x394   :  { %2301 = vmatprep.subr.mxu0 %v4727_v34  ;;  %2372 = vmatprep.subr.mxu1 %v4728_v35 }
 0x395   :  { %2302 = vmatpush1.msra.mxu0 %v4729_v36  ;;  %2373 = vmatpush1.msra.mxu1 %v4730_v37 }
 0x396   :  { %2303 = vmatprep.subr.mxu0 %v4731_v38  ;;  %2374 = vmatprep.subr.mxu1 %v4732_v39 }
 0x397   :  { %2304 = vmatpush1.msra.mxu0 %v4733_v40  ;;  %2337 = vmatprep.mubr.f32.mxu0 %v4734_v41 }
 0x398   :  { %2375 = vmatpush1.msra.mxu1 %v4735_v42  ;;  %2408 = vmatprep.mubr.f32.mxu1 %v4734_v41 }
 0x399   :  { %2447 = vmatprep.subr.mxu0 %v4083_v43  ;;  %2518 = vmatprep.subr.mxu1 %v4228_v59 }
 0x438   :  { %v2165_v60 = vpop.f32.mrf.mxu0  ;;  %v2236_v20 = vpop.f32.mrf.mxu1 }
 0x439   :  { %v2241_v62 = vadd.f32 %v2165_v60, %v4744_v61  ;;  %v2243_v28 = vadd.f32 %v2236_v20, %v4747_v27  ;;  %v4285_v20 = vld [vmem:[#allocation8 + $0xa8] sm:$0xff]  ;;  %v4300_v27 = vld [vmem:[#allocation8 + $0x98] sm:$0xff] }
 0x43a   :  { %v2167_v13 = vpop.f32.mrf.mxu0  ;;  %v2238_v4 = vpop.f32.mrf.mxu1 }
 0x43b   :  { %v3012_v0 = vmul.f32 -1.442695, %v2241_v62  ;;  %v2242_v8 = vadd.f32 %v2167_v13, %v4745_v16  ;;  %v2244_v26 = vadd.f32 %v2238_v4, %v4746_v25  ;;  %v4273_v13 = vld [vmem:[#allocation8 + $0xc8] sm:$0xff]  ;;  %v4279_v16 = vld [vmem:[#allocation8 + $0xc0] sm:$0xff]  ;;  %v4294_v25 = vld [vmem:[#allocation8 + $0xb0] sm:$0xff] }
 0x43c   :  { %v4291_v4 = vld [vmem:[#allocation8 + $0xa0] sm:$0xff] }
 0x43d   :  { %3110 = vpow2.f32 %v3012_v0  ;;  %v3013_v17 = vmul.f32 -1.442695, %v2242_v8  ;;  %v3014_v29 = vmul.f32 -1.442695, %v2244_v26  ;;  %v4276_v0 = vld [vmem:[#allocation8 + $0xd8] sm:$0xff]  ;;  %v4282_v8 = vld [vmem:[#allocation8 + $0xd0] sm:$0xff] }
 0x43e   :  { %v4297_v26 = vld [vmem:[#allocation8 + $0x88] sm:$0xff] }
 0x43f   :  { %3112 = vpow2.f32 %v3013_v17  ;;  %v4288_v17 = vld [vmem:[#allocation8 + $0xb8] sm:$0xff] }
 0x440   :  { %3114 = vtanh.f32 %v2243_v28  ;;  %v4303_v28 = vld [vmem:[#allocation8 + $0x80] sm:$0xff] }
 0x441   :  { %3116 = vpow2.f32 %v3014_v29  ;;  %v4306_v29 = vld [vmem:[#allocation8 + $0x90] sm:$0xff] }
 0x442   :  { %4749 = vst [vmem:[#allocation21_spill] sm:$0xff] %v4306_v29 }
 0x44a   :  { %v3111_v30 = vpop.eup %3110 }
 0x44b   :  { %v2248_v31 = vadd.f32 1.0, %v3111_v30  ;;  %v4309_v30 = vld [vmem:[#allocation8 + $0x68] sm:$0xff] }
 0x44c   :  { %v3113_v32 = vpop.eup %3112  ;;  %4750 = vst [vmem:[#allocation22_spill] sm:$0xff] %v4309_v30 }
 0x44d   :  { %3118 = vrcp.f32 %v2248_v31  ;;  %v2254_v33 = vadd.f32 1.0, %v3113_v32  ;;  %v3115_v34 = vpop.eup %3114  ;;  %v4312_v31 = vld [vmem:[#allocation8 + $0x78] sm:$0xff]  ;;  %v4315_v32 = vld [vmem:[#allocation8 + $0x60] sm:$0xff] }
 0x44e   :  { %v3117_v35 = vpop.eup %3116  ;;  %4751 = vst [vmem:[#allocation23_spill] sm:$0xff] %v4312_v31  ;;  %4752 = vst [vmem:[#allocation24_spill] sm:$0xff] %v4315_v32 }
 0x44f   :  { %3120 = vrcp.f32 %v2254_v33  ;;  %v2261_v39 = vadd.f32 1.0, %v3117_v35  ;;  %v4318_v33 = vld [vmem:[#allocation8 + $0x70] sm:$0xff]  ;;  %v4324_v35 = vld [vmem:[#allocation8 + $0x58] sm:$0xff] }
 0x450   :  { %4753 = vst [vmem:[#allocation25_spill] sm:$0xff] %v4318_v33  ;;  %4755 = vst [vmem:[#allocation43_spill] sm:$0xff] %v4324_v35 }
 0x451   :  { %3122 = vrcp.f32 %v2261_v39  ;;  %v4336_v39 = vld [vmem:[#allocation8 + $0x38] sm:$0xff] }
 0x452   :  { %4759 = vst [vmem:[#allocation26_spill] sm:$0xff] %v4336_v39 }
 0x45a   :  { %v3119_v36 = vpop.eup %3118 }
 0x45b   :  { %v2265_v37 = vmul.f32 %v3119_v36, %v3115_v34  ;;  %v4321_v34 = vld [vmem:[#allocation8 + $0x48] sm:$0xff]  ;;  %v4327_v36 = vld [vmem:[#allocation8 + $0x40] sm:$0xff] }
 0x45c   :  { %v3121_v38 = vpop.eup %3120  ;;  %4754 = vst [vmem:[#allocation16_spill] sm:$0xff] %v4321_v34  ;;  %4756 = vst [vmem:[#allocation44_spill] sm:$0xff] %v4327_v36 }
 0x45d   :  { %v2264_v40 = vmul.f32 %v3121_v38, %v4092_v23  ;;  %v4748_v23 = vld [vmem:[#allocation19_spill] sm:$0xff]  ;;  %v4333_v38 = vld [vmem:[#allocation8 + $0x28] sm:$0xff] }
 0x45e   :  { %v3123_v60 = vpop.eup %3122  ;;  %4758 = vst [vmem:[#allocation45_spill] sm:$0xff] %v4333_v38 }
 0x45f   :  { %v4236_v42 = vadd.f32 %v2265_v37, %v2264_v40  ;;  %v4330_v37 = vld [vmem:[#allocation8 + $0x50] sm:$0xff]  ;;  %v4339_v40 = vld [vmem:[#allocation8 + $0x20] sm:$0xff] }
 0x460   :  { %4757 = vst [vmem:[#allocation46_spill] sm:$0xff] %v4330_v37  ;;  %4760 = vst [vmem:[#allocation27_spill] sm:$0xff] %v4339_v40 }
 0x461   :  { %3124 = vtanh.f32 %v4236_v42 }
 0x46e   :  { %v3125_v61 = vpop.eup %3124 }
 0x46f   :  { %v2268_v62 = vmul.f32 %v3125_v61, %v3123_v60  ;;  %v4342_v60 = vld [vmem:[#allocation8 + $0x30] sm:$0xff]  ;;  %v4345_v61 = vld [vmem:[#allocation8 + $0x8] sm:$0xff] }
 0x470   :  { %4761 = vst [vmem:[#allocation28_spill] sm:$0xff] %v4342_v60  ;;  %4762 = vst [vmem:[#allocation29_spill] sm:$0xff] %v4345_v61 }
 0x471   :  { %2338 = vmatmul.mubr.f32.vlgmr.msra.gmra.mxu0 %v2268_v62  ;;  %2409 = vmatmul.mubr.f32.vlgmr.msra.gmra.mxu1 %v2268_v62  ;;  %v4348_v62 = vld [vmem:[#allocation8 + $0x18] sm:$0xff] }
 0x472   :  { %2448 = vmatpush1.msra.mxu0 %v4095_v6  ;;  %2519 = vmatpush1.msra.mxu1 %v4098_v12  ;;  %4763 = vst [vmem:[#allocation30_spill] sm:$0xff] %v4348_v62 }
 0x473   :  { %2449 = vmatprep.subr.mxu0 %v4101_v44  ;;  %2520 = vmatprep.subr.mxu1 %v4104_v5 }
 0x474   :  { %2450 = vmatpush1.msra.mxu0 %v4107_v45  ;;  %2521 = vmatpush1.msra.mxu1 %v4110_v46 }
 0x475   :  { %2451 = vmatprep.subr.mxu0 %v4113_v47  ;;  %2522 = vmatprep.subr.mxu1 %v4116_v48 }
 0x476   :  { %2452 = vmatpush1.msra.mxu0 %v4119_v49  ;;  %2523 = vmatpush1.msra.mxu1 %v4122_v50 }
 0x477   :  { %2453 = vmatprep.subr.mxu0 %v4125_v51  ;;  %2524 = vmatprep.subr.mxu1 %v4128_v52 }
 0x478   :  { %2454 = vmatpush1.msra.mxu0 %v4131_v53  ;;  %2525 = vmatpush1.msra.mxu1 %v4134_v54 }
 0x479   :  { %2455 = vmatprep.subr.mxu0 %v4137_v55  ;;  %2526 = vmatprep.subr.mxu1 %v4140_v56 }
 0x47a   :  { %2456 = vmatpush1.msra.mxu0 %v4143_v57  ;;  %2527 = vmatpush1.msra.mxu1 %v4146_v58 }
 0x47b   :  { %2457 = vmatprep.subr.mxu0 %v4149_v21  ;;  %2528 = vmatprep.subr.mxu1 %v4152_v22 }
 0x47c   :  { %2458 = vmatpush1.msra.mxu0 %v4155_v14  ;;  %2529 = vmatpush1.msra.mxu1 %v4158_v24 }
 0x47d   :  { %2459 = vmatprep.subr.mxu0 %v4161_v63  ;;  %2530 = vmatprep.subr.mxu1 %v4164_v10 }
 0x47e   :  { %2460 = vmatpush1.msra.mxu0 %v4167_v1  ;;  %2531 = vmatpush1.msra.mxu1 %v4170_v19 }
 0x47f   :  { %2461 = vmatprep.subr.mxu0 %v4173_v9  ;;  %2532 = vmatprep.subr.mxu1 %v4748_v23 }
 0x480   :  { %2462 = vmatpush1.msra.mxu0 %v4179_v11  ;;  %2533 = vmatpush1.msra.mxu1 %v4182_v2 }
 0x481   :  { %2463 = vmatprep.subr.mxu0 %v4185_v3  ;;  %2534 = vmatprep.subr.mxu1 %v4188_v18 }
 0x482   :  { %2464 = vmatpush1.msra.mxu0 %v4191_v15  ;;  %2535 = vmatpush1.msra.mxu1 %v4194_v7 }
 0x483   :  { %2465 = vmatprep.subr.mxu0 %v4273_v13  ;;  %2536 = vmatprep.subr.mxu1 %v4276_v0 }
 0x484   :  { %2466 = vmatpush1.msra.mxu0 %v4279_v16  ;;  %2537 = vmatpush1.msra.mxu1 %v4282_v8 }
 0x485   :  { %2467 = vmatprep.subr.mxu0 %v4285_v20  ;;  %2538 = vmatprep.subr.mxu1 %v4288_v17 }
 0x486   :  { %2468 = vmatpush1.msra.mxu0 %v4291_v4  ;;  %2539 = vmatpush1.msra.mxu1 %v4294_v25 }
 0x487   :  { %2469 = vmatprep.subr.mxu0 %v4297_v26  ;;  %2540 = vmatprep.subr.mxu1 %v4300_v27 }
 0x488   :  { %2470 = vmatpush1.msra.mxu0 %v4303_v28  ;;  %2541 = vmatpush1.msra.mxu1 %v4306_v29 }
 0x489   :  { %2471 = vmatprep.subr.mxu0 %v4309_v30  ;;  %2542 = vmatprep.subr.mxu1 %v4312_v31  ;;  %v4769_v31 = vld [vmem:[#allocation57_spill] sm:$0xff] }
 0x48a   :  { %2472 = vmatpush1.msra.mxu0 %v4315_v32  ;;  %2543 = vmatpush1.msra.mxu1 %v4318_v33  ;;  %v4768_v32 = vld [vmem:[#allocation58_spill] sm:$0xff] }
 0x48b   :  { %2473 = vmatprep.subr.mxu0 %v4321_v34  ;;  %2544 = vmatprep.subr.mxu1 %v4324_v35 }
 0x48c   :  { %2474 = vmatpush1.msra.mxu0 %v4327_v36  ;;  %2545 = vmatpush1.msra.mxu1 %v4330_v37  ;;  %v4767_v36 = vld [vmem:[#allocation56_spill] sm:$0xff] }
 0x48d   :  { %2475 = vmatprep.subr.mxu0 %v4333_v38  ;;  %2546 = vmatprep.subr.mxu1 %v4336_v39  ;;  %v4351_v38 = vld [vmem:[#allocation8] sm:$0xff]  ;;  %v4355_v39 = vld [vmem:[#allocation8 + $0x10] sm:$0xff] }
 0x48e   :  { %2476 = vmatpush1.msra.mxu0 %v4339_v40  ;;  %2547 = vmatpush1.msra.mxu1 %v4342_v60  ;;  %4764 = vst [vmem:[#allocation31_spill] sm:$0xff] %v4351_v38  ;;  %4765 = vst [vmem:[#allocation32_spill] sm:$0xff] %v4355_v39  ;;  %v4766_v60 = vld [vmem:[#allocation55_spill] sm:$0xff] }
 0x48f   :  { %2477 = vmatprep.subr.mxu0 %v4345_v61  ;;  %2548 = vmatprep.subr.mxu1 %v4348_v62 }
 0x490   :  { %2478 = vmatpush1.msra.mxu0 %v4351_v38  ;;  %2511 = vmatprep.mubr.f32.mxu0 %v4734_v41 }
 0x491   :  { %2549 = vmatpush1.msra.mxu1 %v4355_v39  ;;  %2582 = vmatprep.mubr.f32.mxu1 %v4734_v41 }
 0x492   :  { %2621 = vmatprep.subr.mxu0 %v4083_v43  ;;  %2692 = vmatprep.subr.mxu1 %v4228_v59 }
 0x531   :  { %v2339_v61 = vpop.f32.mrf.mxu0  ;;  %v2410_v38 = vpop.f32.mrf.mxu1 }
 0x532   :  { %v2415_v40 = vadd.f32 %v2339_v61, %v4766_v60  ;;  %v2417_v41 = vadd.f32 %v2410_v38, %v4769_v31  ;;  %v4775_v38 = vld [vmem:[#allocation16_spill] sm:$0xff] }
 0x533   :  { %v2341_v62 = vpop.f32.mrf.mxu0  ;;  %v2412_v33 = vpop.f32.mrf.mxu1 }
 0x534   :  { %v3015_v37 = vmul.f32 -1.442695, %v2415_v40  ;;  %v2416_v35 = vadd.f32 %v2341_v62, %v4767_v36  ;;  %v2418_v39 = vadd.f32 %v2412_v33, %v4768_v32  ;;  %v4774_v33 = vld [vmem:[#allocation25_spill] sm:$0xff] }
 0x536   :  { %3126 = vpow2.f32 %v3015_v37  ;;  %v3016_v34 = vmul.f32 -1.442695, %v2416_v35  ;;  %v3017_v30 = vmul.f32 -1.442695, %v2418_v39  ;;  %v4776_v39 = vld [vmem:[#allocation43_spill] sm:$0xff] }
 0x538   :  { %3128 = vpow2.f32 %v3016_v34 }
 0x539   :  { %3130 = vtanh.f32 %v2417_v41 }
 0x53a   :  { %3132 = vpow2.f32 %v3017_v30  ;;  %v4773_v30 = vld [vmem:[#allocation24_spill] sm:$0xff] }
 0x543   :  { %v3127_v43 = vpop.eup %3126 }
 0x544   :  { %v2422_v29 = vadd.f32 1.0, %v3127_v43 }
 0x545   :  { %v3129_v59 = vpop.eup %3128 }
 0x546   :  { %3134 = vrcp.f32 %v2422_v29  ;;  %v2428_v60 = vadd.f32 1.0, %v3129_v59  ;;  %v3131_v40 = vpop.eup %3130  ;;  %v4770_v59 = vld [vmem:[#allocation21_spill] sm:$0xff]  ;;  %v4772_v29 = vld [vmem:[#allocation23_spill] sm:$0xff] }
 0x547   :  { %v3133_v36 = vpop.eup %3132 }
 0x548   :  { %3136 = vrcp.f32 %v2428_v60  ;;  %v2435_v34 = vadd.f32 1.0, %v3133_v36  ;;  %v4777_v60 = vld [vmem:[#allocation44_spill] sm:$0xff]  ;;  %v4779_v36 = vld [vmem:[#allocation45_spill] sm:$0xff] }
 0x54a   :  { %3138 = vrcp.f32 %v2435_v34  ;;  %v4783_v34 = vld [vmem:[#allocation29_spill] sm:$0xff] }
 0x553   :  { %v3135_v37 = vpop.eup %3134 }
 0x554   :  { %v2439_v61 = vmul.f32 %v3135_v37, %v3131_v40  ;;  %v4778_v40 = vld [vmem:[#allocation46_spill] sm:$0xff] }
 0x555   :  { %v3137_v35 = vpop.eup %3136  ;;  %v4780_v37 = vld [vmem:[#allocation26_spill] sm:$0xff] }
 0x556   :  { %v2438_v62 = vmul.f32 %v3137_v35, %v4236_v42  ;;  %v4771_v42 = vld [vmem:[#allocation22_spill] sm:$0xff]  ;;  %v4782_v35 = vld [vmem:[#allocation28_spill] sm:$0xff] }
 0x557   :  { %v3139_v43 = vpop.eup %3138 }
 0x558   :  { %v4366_v32 = vadd.f32 %v2439_v61, %v2438_v62  ;;  %v4781_v61 = vld [vmem:[#allocation27_spill] sm:$0xff]  ;;  %v4784_v62 = vld [vmem:[#allocation30_spill] sm:$0xff] }
 0x55a   :  { %3140 = vtanh.f32 %v4366_v32 }
 0x567   :  { %v3141_v41 = vpop.eup %3140 }
 0x568   :  { %v2442_v31 = vmul.f32 %v3141_v41, %v3139_v43  ;;  %v4785_v43 = vld [vmem:[#allocation31_spill] sm:$0xff]  ;;  %v4786_v41 = vmov 0.0  }
 0x56a   :  { %2512 = vmatmul.mubr.f32.vlgmr.msra.gmra.mxu0 %v2442_v31  ;;  %2583 = vmatmul.mubr.f32.vlgmr.msra.gmra.mxu1 %v2442_v31  ;;  %v4787_v31 = vld [vmem:[#allocation32_spill] sm:$0xff] }
 0x56b   :  { %2622 = vmatpush1.msra.mxu0 %v4095_v6  ;;  %2693 = vmatpush1.msra.mxu1 %v4098_v12 }
 0x56c   :  { %2623 = vmatprep.subr.mxu0 %v4101_v44  ;;  %2694 = vmatprep.subr.mxu1 %v4104_v5 }
 0x56d   :  { %2624 = vmatpush1.msra.mxu0 %v4107_v45  ;;  %2695 = vmatpush1.msra.mxu1 %v4110_v46 }
 0x56e   :  { %2625 = vmatprep.subr.mxu0 %v4113_v47  ;;  %2696 = vmatprep.subr.mxu1 %v4116_v48 }
 0x56f   :  { %2626 = vmatpush1.msra.mxu0 %v4119_v49  ;;  %2697 = vmatpush1.msra.mxu1 %v4122_v50 }
 0x570   :  { %2627 = vmatprep.subr.mxu0 %v4125_v51  ;;  %2698 = vmatprep.subr.mxu1 %v4128_v52 }
 0x571   :  { %2628 = vmatpush1.msra.mxu0 %v4131_v53  ;;  %2699 = vmatpush1.msra.mxu1 %v4134_v54 }
 0x572   :  { %2629 = vmatprep.subr.mxu0 %v4137_v55  ;;  %2700 = vmatprep.subr.mxu1 %v4140_v56 }
 0x573   :  { %2630 = vmatpush1.msra.mxu0 %v4143_v57  ;;  %2701 = vmatpush1.msra.mxu1 %v4146_v58 }
 0x574   :  { %2631 = vmatprep.subr.mxu0 %v4149_v21  ;;  %2702 = vmatprep.subr.mxu1 %v4152_v22 }
 0x575   :  { %2632 = vmatpush1.msra.mxu0 %v4155_v14  ;;  %2703 = vmatpush1.msra.mxu1 %v4158_v24 }
 0x576   :  { %2633 = vmatprep.subr.mxu0 %v4161_v63  ;;  %2704 = vmatprep.subr.mxu1 %v4164_v10 }
 0x577   :  { %2634 = vmatpush1.msra.mxu0 %v4167_v1  ;;  %2705 = vmatpush1.msra.mxu1 %v4170_v19 }
 0x578   :  { %2635 = vmatprep.subr.mxu0 %v4173_v9  ;;  %2706 = vmatprep.subr.mxu1 %v4748_v23 }
 0x579   :  { %2636 = vmatpush1.msra.mxu0 %v4179_v11  ;;  %2707 = vmatpush1.msra.mxu1 %v4182_v2 }
 0x57a   :  { %2637 = vmatprep.subr.mxu0 %v4185_v3  ;;  %2708 = vmatprep.subr.mxu1 %v4188_v18 }
 0x57b   :  { %2638 = vmatpush1.msra.mxu0 %v4191_v15  ;;  %2709 = vmatpush1.msra.mxu1 %v4194_v7 }
 0x57c   :  { %2639 = vmatprep.subr.mxu0 %v4273_v13  ;;  %2710 = vmatprep.subr.mxu1 %v4276_v0 }
 0x57d   :  { %2640 = vmatpush1.msra.mxu0 %v4279_v16  ;;  %2711 = vmatpush1.msra.mxu1 %v4282_v8 }
 0x57e   :  { %2641 = vmatprep.subr.mxu0 %v4285_v20  ;;  %2712 = vmatprep.subr.mxu1 %v4288_v17 }
 0x57f   :  { %2642 = vmatpush1.msra.mxu0 %v4291_v4  ;;  %2713 = vmatpush1.msra.mxu1 %v4294_v25 }
 0x580   :  { %2643 = vmatprep.subr.mxu0 %v4297_v26  ;;  %2714 = vmatprep.subr.mxu1 %v4300_v27 }
 0x581   :  { %2644 = vmatpush1.msra.mxu0 %v4303_v28  ;;  %2715 = vmatpush1.msra.mxu1 %v4770_v59 }
 0x582   :  { %2645 = vmatprep.subr.mxu0 %v4771_v42  ;;  %2716 = vmatprep.subr.mxu1 %v4772_v29  ;;  %v4793_v29 = vld [vmem:[#allocation61_spill] sm:$0xff] }
 0x583   :  { %2646 = vmatpush1.msra.mxu0 %v4773_v30  ;;  %2717 = vmatpush1.msra.mxu1 %v4774_v33  ;;  %v4792_v30 = vld [vmem:[#allocation62_spill] sm:$0xff] }
 0x584   :  { %2647 = vmatprep.subr.mxu0 %v4775_v38  ;;  %2718 = vmatprep.subr.mxu1 %v4776_v39 }
 0x585   :  { %2648 = vmatpush1.msra.mxu0 %v4777_v60  ;;  %2719 = vmatpush1.msra.mxu1 %v4778_v40  ;;  %v4788_v40 = vld [vmem:[#allocation18_spill] sm:$0xff] }
 0x586   :  { %2649 = vmatprep.subr.mxu0 %v4779_v36  ;;  %2720 = vmatprep.subr.mxu1 %v4780_v37  ;;  %v4789_v36 = vld [vmem:[#allocation20_spill] sm:$0xff] }
 0x587   :  { %2650 = vmatpush1.msra.mxu0 %v4781_v61  ;;  %2721 = vmatpush1.msra.mxu1 %v4782_v35  ;;  %v4790_v61 = vld [vmem:[#allocation59_spill] sm:$0xff] }
 0x588   :  { %2651 = vmatprep.subr.mxu0 %v4783_v34  ;;  %2722 = vmatprep.subr.mxu1 %v4784_v62  ;;  %v4791_v34 = vld [vmem:[#allocation60_spill] sm:$0xff] }
 0x589   :  { %2652 = vmatpush1.msra.mxu0 %v4785_v43  ;;  %2685 = vmatprep.mubr.f32.mxu0 %v4786_v41 }
 0x58a   :  { %2723 = vmatpush1.msra.mxu1 %v4787_v31  ;;  %2756 = vmatprep.mubr.f32.mxu1 %v4786_v41 }
 0x58b   :  { %2795 = vmatprep.subr.mxu0 %v4788_v40  ;;  %2866 = vmatprep.subr.mxu1 %v4789_v36 }
 0x62a   :  { %v2513_v37 = vpop.f32.mrf.mxu0  ;;  %v2584_v62 = vpop.f32.mrf.mxu1 }
 0x62b   :  { %v2589_v60 = vadd.f32 %v2513_v37, %v4790_v61  ;;  %v2591_v41 = vadd.f32 %v2584_v62, %v4793_v29 }
 0x62c   :  { %v2515_v35 = vpop.f32.mrf.mxu0  ;;  %v2586_v33 = vpop.f32.mrf.mxu1 }
 0x62d   :  { %v3018_v39 = vmul.f32 -1.442695, %v2589_v60  ;;  %v2590_v38 = vadd.f32 %v2515_v35, %v4791_v34  ;;  %v2592_v31 = vadd.f32 %v2586_v33, %v4792_v30 }
 0x62f   :  { %3142 = vpow2.f32 %v3018_v39  ;;  %v3019_v43 = vmul.f32 -1.442695, %v2590_v38  ;;  %v3020_v42 = vmul.f32 -1.442695, %v2592_v31  ;;  %v4816_v31 = vld [vmem:[#allocation67_spill] sm:$0xff] }
 0x631   :  { %3144 = vpow2.f32 %v3019_v43 }
 0x632   :  { %3146 = vtanh.f32 %v2591_v41 }
 0x633   :  { %3148 = vpow2.f32 %v3020_v42 }
 0x63c   :  { %v3143_v40 = vpop.eup %3142 }
 0x63d   :  { %v2596_v59 = vadd.f32 1.0, %v3143_v40 }
 0x63e   :  { %v3145_v36 = vpop.eup %3144 }
 0x63f   :  { %3150 = vrcp.f32 %v2596_v59  ;;  %v2602_v37 = vadd.f32 1.0, %v3145_v36  ;;  %v3147_v60 = vpop.eup %3146 }
 0x640   :  { %v3149_v61 = vpop.eup %3148 }
 0x641   :  { %3152 = vrcp.f32 %v2602_v37  ;;  %v2609_v34 = vadd.f32 1.0, %v3149_v61 }
 0x643   :  { %3154 = vrcp.f32 %v2609_v34  ;;  %v4818_v34 = vld [vmem:[#allocation70_spill] sm:$0xff] }
 0x64c   :  { %v3151_v39 = vpop.eup %3150 }
 0x64d   :  { %v2613_v35 = vmul.f32 %v3151_v39, %v3147_v60  ;;  %v4817_v60 = vld [vmem:[#allocation68_spill] sm:$0xff] }
 0x64e   :  { %v3153_v38 = vpop.eup %3152 }
 0x64f   :  { %v2612_v43 = vmul.f32 %v3153_v38, %v4366_v32 }
 0x650   :  { %v3155_v29 = vpop.eup %3154 }
 0x651   :  { %v4440_v30 = vadd.f32 %v2613_v35, %v2612_v43 }
 0x653   :  { %3156 = vtanh.f32 %v4440_v30 }
 0x660   :  { %v3157_v33 = vpop.eup %3156 }
 0x661   :  { %v2616_v62 = vmul.f32 %v3157_v33, %v3155_v29 }
 0x663   :  { %2686 = vmatmul.mubr.f32.vlgmr.msra.gmra.mxu0 %v2616_v62  ;;  %2757 = vmatmul.mubr.f32.vlgmr.msra.gmra.mxu1 %v2616_v62 }
 0x664   :  { %2796 = vmatpush1.msra.mxu0 %v4095_v6  ;;  %2867 = vmatpush1.msra.mxu1 %v4098_v12  ;;  %v4794_v6 = vld [vmem:[#allocation21_spill] sm:$0xff]  ;;  %v4795_v12 = vld [vmem:[#allocation22_spill] sm:$0xff] }
 0x665   :  { %2797 = vmatprep.subr.mxu0 %v4101_v44  ;;  %2868 = vmatprep.subr.mxu1 %v4104_v5  ;;  %v4796_v44 = vld [vmem:[#allocation23_spill] sm:$0xff]  ;;  %v4797_v5 = vld [vmem:[#allocation24_spill] sm:$0xff] }
 0x666   :  { %2798 = vmatpush1.msra.mxu0 %v4107_v45  ;;  %2869 = vmatpush1.msra.mxu1 %v4110_v46  ;;  %v4798_v45 = vld [vmem:[#allocation25_spill] sm:$0xff]  ;;  %v4799_v46 = vld [vmem:[#allocation16_spill] sm:$0xff] }
 0x667   :  { %2799 = vmatprep.subr.mxu0 %v4113_v47  ;;  %2870 = vmatprep.subr.mxu1 %v4116_v48  ;;  %v4800_v47 = vld [vmem:[#allocation43_spill] sm:$0xff]  ;;  %v4801_v48 = vld [vmem:[#allocation44_spill] sm:$0xff] }
 0x668   :  { %2800 = vmatpush1.msra.mxu0 %v4119_v49  ;;  %2871 = vmatpush1.msra.mxu1 %v4122_v50  ;;  %v4802_v49 = vld [vmem:[#allocation46_spill] sm:$0xff]  ;;  %v4803_v50 = vld [vmem:[#allocation45_spill] sm:$0xff] }
 0x669   :  { %2801 = vmatprep.subr.mxu0 %v4125_v51  ;;  %2872 = vmatprep.subr.mxu1 %v4128_v52  ;;  %v4804_v51 = vld [vmem:[#allocation26_spill] sm:$0xff]  ;;  %v4805_v52 = vld [vmem:[#allocation27_spill] sm:$0xff] }
 0x66a   :  { %2802 = vmatpush1.msra.mxu0 %v4131_v53  ;;  %2873 = vmatpush1.msra.mxu1 %v4134_v54  ;;  %v4806_v53 = vld [vmem:[#allocation28_spill] sm:$0xff]  ;;  %v4807_v54 = vld [vmem:[#allocation29_spill] sm:$0xff] }
 0x66b   :  { %2803 = vmatprep.subr.mxu0 %v4137_v55  ;;  %2874 = vmatprep.subr.mxu1 %v4140_v56  ;;  %v4808_v55 = vld [vmem:[#allocation30_spill] sm:$0xff]  ;;  %v4809_v56 = vld [vmem:[#allocation31_spill] sm:$0xff] }
 0x66c   :  { %2804 = vmatpush1.msra.mxu0 %v4143_v57  ;;  %2875 = vmatpush1.msra.mxu1 %v4146_v58  ;;  %v4810_v57 = vmov 0.0   ;;  %v4811_v58 = vld [vmem:[#allocation32_spill] sm:$0xff] }
 0x66d   :  { %2805 = vmatprep.subr.mxu0 %v4149_v21  ;;  %2876 = vmatprep.subr.mxu1 %v4152_v22  ;;  %v4812_v22 = vld [vmem:[#allocation63_spill] sm:$0xff] }
 0x66e   :  { %2806 = vmatpush1.msra.mxu0 %v4155_v14  ;;  %2877 = vmatpush1.msra.mxu1 %v4158_v24 }
 0x66f   :  { %2807 = vmatprep.subr.mxu0 %v4161_v63  ;;  %2878 = vmatprep.subr.mxu1 %v4164_v10  ;;  %v4813_v10 = vld [vmem:[#allocation64_spill] sm:$0xff] }
 0x670   :  { %2808 = vmatpush1.msra.mxu0 %v4167_v1  ;;  %2879 = vmatpush1.msra.mxu1 %v4170_v19 }
 0x671   :  { %2809 = vmatprep.subr.mxu0 %v4173_v9  ;;  %2880 = vmatprep.subr.mxu1 %v4748_v23 }
 0x672   :  { %2810 = vmatpush1.msra.mxu0 %v4179_v11  ;;  %2881 = vmatpush1.msra.mxu1 %v4182_v2  ;;  %v4814_v11 = vld [vmem:[#allocation66_spill] sm:$0xff] }
 0x673   :  { %2811 = vmatprep.subr.mxu0 %v4185_v3  ;;  %2882 = vmatprep.subr.mxu1 %v4188_v18  ;;  %v4815_v3 = vld [vmem:[#allocation65_spill] sm:$0xff] }
 0x674   :  { %2812 = vmatpush1.msra.mxu0 %v4191_v15  ;;  %2883 = vmatpush1.msra.mxu1 %v4194_v7 }
 0x675   :  { %2813 = vmatprep.subr.mxu0 %v4273_v13  ;;  %2884 = vmatprep.subr.mxu1 %v4276_v0 }
 0x676   :  { %2814 = vmatpush1.msra.mxu0 %v4279_v16  ;;  %2885 = vmatpush1.msra.mxu1 %v4282_v8 }
 0x677   :  { %2815 = vmatprep.subr.mxu0 %v4285_v20  ;;  %2886 = vmatprep.subr.mxu1 %v4288_v17 }
 0x678   :  { %2816 = vmatpush1.msra.mxu0 %v4291_v4  ;;  %2887 = vmatpush1.msra.mxu1 %v4294_v25 }
 0x679   :  { %2817 = vmatprep.subr.mxu0 %v4297_v26  ;;  %2888 = vmatprep.subr.mxu1 %v4300_v27 }
 0x67a   :  { %2818 = vmatpush1.msra.mxu0 %v4303_v28  ;;  %2889 = vmatpush1.msra.mxu1 %v4794_v6 }
 0x67b   :  { %2819 = vmatprep.subr.mxu0 %v4795_v12  ;;  %2890 = vmatprep.subr.mxu1 %v4796_v44 }
 0x67c   :  { %2820 = vmatpush1.msra.mxu0 %v4797_v5  ;;  %2891 = vmatpush1.msra.mxu1 %v4798_v45 }
 0x67d   :  { %2821 = vmatprep.subr.mxu0 %v4799_v46  ;;  %2892 = vmatprep.subr.mxu1 %v4800_v47 }
 0x67e   :  { %2822 = vmatpush1.msra.mxu0 %v4801_v48  ;;  %2893 = vmatpush1.msra.mxu1 %v4802_v49 }
 0x67f   :  { %2823 = vmatprep.subr.mxu0 %v4803_v50  ;;  %2894 = vmatprep.subr.mxu1 %v4804_v51 }
 0x680   :  { %2824 = vmatpush1.msra.mxu0 %v4805_v52  ;;  %2895 = vmatpush1.msra.mxu1 %v4806_v53 }
 0x681   :  { %2825 = vmatprep.subr.mxu0 %v4807_v54  ;;  %2896 = vmatprep.subr.mxu1 %v4808_v55 }
 0x682   :  { %2826 = vmatpush1.msra.mxu0 %v4809_v56  ;;  %2859 = vmatprep.mubr.f32.mxu0 %v4810_v57 }
 0x683   :  { %2897 = vmatpush1.msra.mxu1 %v4811_v58  ;;  %2930 = vmatprep.mubr.f32.mxu1 %v4810_v57 }
 0x723   :  { %v2687_v21 = vpop.f32.mrf.mxu0  ;;  %v2758_v19 = vpop.f32.mrf.mxu1 }
 0x724   :  { %v2763_v14 = vadd.f32 %v2687_v21, %v4812_v22  ;;  %v2765_v18 = vadd.f32 %v2758_v19, %v4815_v3 }
 0x725   :  { %v2689_v24 = vpop.f32.mrf.mxu0  ;;  %v2760_v7 = vpop.f32.mrf.mxu1 }
 0x726   :  { %v3021_v63 = vmul.f32 -1.442695, %v2763_v14  ;;  %v2764_v1 = vadd.f32 %v2689_v24, %v4813_v10  ;;  %v2766_v2 = vadd.f32 %v2760_v7, %v4814_v11 }
 0x728   :  { %3158 = vpow2.f32 %v3021_v63  ;;  %v3022_v9 = vmul.f32 -1.442695, %v2764_v1  ;;  %v3023_v15 = vmul.f32 -1.442695, %v2766_v2 }
 0x72a   :  { %3160 = vpow2.f32 %v3022_v9 }
 0x72b   :  { %3162 = vtanh.f32 %v2765_v18 }
 0x72c   :  { %3164 = vpow2.f32 %v3023_v15 }
 0x735   :  { %v3159_v23 = vpop.eup %3158 }
 0x736   :  { %v2770_v13 = vadd.f32 1.0, %v3159_v23 }
 0x737   :  { %v3161_v0 = vpop.eup %3160 }
 0x738   :  { %3166 = vrcp.f32 %v2770_v13  ;;  %v2776_v16 = vadd.f32 1.0, %v3161_v0  ;;  %v3163_v8 = vpop.eup %3162 }
 0x739   :  { %v3165_v20 = vpop.eup %3164 }
 0x73a   :  { %3168 = vrcp.f32 %v2776_v16  ;;  %v2783_v26 = vadd.f32 1.0, %v3165_v20 }
 0x73c   :  { %3170 = vrcp.f32 %v2783_v26 }
 0x745   :  { %v3167_v17 = vpop.eup %3166 }
 0x746   :  { %v2787_v4 = vmul.f32 %v3167_v17, %v3163_v8 }
 0x747   :  { %v3169_v25 = vpop.eup %3168 }
 0x748   :  { %v2786_v27 = vmul.f32 %v3169_v25, %v4440_v30  ;;  %v4819_v30 = vld [vmem:[#allocation69_spill] sm:$0xff] }
 0x749   :  { %v3171_v32 = vpop.eup %3170 }
 0x74a   :  { %v2788_v28 = vadd.f32 %v2787_v4, %v2786_v27 }
 0x74c   :  { %3172 = vtanh.f32 %v2788_v28 }
 0x759   :  { %v3173_v59 = vpop.eup %3172 }
 0x75a   :  { %v2790_v42 = vmul.f32 %v3173_v59, %v3171_v32 }
 0x75c   :  { %2860 = vmatmul.mubr.f32.vlgmr.msra.gmra.mxu0 %v2790_v42  ;;  %2931 = vmatmul.mubr.f32.vlgmr.msra.gmra.mxu1 %v2790_v42 }
 0x81c   :  { %v2861_v41 = vpop.f32.mrf.mxu0  ;;  %v2932_v39 = vpop.f32.mrf.mxu1 }
 0x81d   :  { %v2937_v40 = vadd.f32 %v2861_v41, %v4816_v31  ;;  %v2939_v29 = vadd.f32 %v2932_v39, %v4819_v30 }
 0x81e   :  { %v2863_v36 = vpop.f32.mrf.mxu0  ;;  %v2934_v38 = vpop.f32.mrf.mxu1 }
 0x81f   :  { %v3024_v37 = vmul.f32 -1.442695, %v2937_v40  ;;  %v2938_v61 = vadd.f32 %v2863_v36, %v4817_v60  ;;  %v2940_v43 = vadd.f32 %v2934_v38, %v4818_v34 }
 0x821   :  { %3174 = vpow2.f32 %v3024_v37  ;;  %v3025_v35 = vmul.f32 -1.442695, %v2938_v61  ;;  %v3026_v33 = vmul.f32 -1.442695, %v2940_v43 }
 0x823   :  { %3176 = vpow2.f32 %v3025_v35 }
 0x824   :  { %3178 = vtanh.f32 %v2939_v29 }
 0x825   :  { %3180 = vpow2.f32 %v3026_v33 }
 0x82e   :  { %v3175_v62 = vpop.eup %3174 }
 0x82f   :  { %v2944_v6 = vadd.f32 1.0, %v3175_v62 }
 0x830   :  { %v3177_v12 = vpop.eup %3176 }
 0x831   :  { %3182 = vrcp.f32 %v2944_v6  ;;  %v2950_v44 = vadd.f32 1.0, %v3177_v12  ;;  %v3179_v5 = vpop.eup %3178 }
 0x832   :  { %v3181_v45 = vpop.eup %3180 }
 0x833   :  { %3184 = vrcp.f32 %v2950_v44  ;;  %v2957_v49 = vadd.f32 1.0, %v3181_v45 }
 0x835   :  { %3186 = vrcp.f32 %v2957_v49 }
 0x83e   :  { %v3183_v46 = vpop.eup %3182 }
 0x83f   :  { %v2961_v47 = vmul.f32 %v3183_v46, %v3179_v5 }
 0x840   :  { %v3185_v48 = vpop.eup %3184 }
 0x841   :  { %v2960_v50 = vmul.f32 %v3185_v48, %v2788_v28 }
 0x842   :  { %v3187_v52 = vpop.eup %3186 }
 0x843   :  { %v2962_v51 = vadd.f32 %v2961_v47, %v2960_v50 }
 0x845   :  { %3188 = vtanh.f32 %v2962_v51 }
 0x852   :  { %v3189_v53 = vpop.eup %3188 }
 0x853   :  { %v2964_v54 = vmul.f32 %v3189_v53, %v3187_v52 }
 0x855   :  { %2965 = vst [vmem:[#allocation11] sm:$0xff] %v2964_v54 }
 0x856   :  { %3345 = shalt.err (!%p3342_p10)
}
 0x857   :  { %2975 = dma.vmem_to_hbm [thread:$0]  %s2973_s22, 256, %s4525_s6, [#allocation5]  }
 0x858   :  { %3360 = dma.done.wait [#allocation5], 256  }
 0x859   :  { %3361 = vsyncadd [#allocation5], 4294967040 }
 0x85a   :  { %2979 = vsyncpa [#allocation4], 1 }
 0x85b   :  { %2980 = vsyncpa [#allocation7], 1 }
 0x85c   :  { %2981 = vsyncpa [#allocation10], 1 }
 0x85d   :  { %2982 = vsyncpa [#allocation5], 1 }

</bundles_post_ra>
